<compile_context>
chip_gen: v6e
topology: v6e:2x2x1
jax: 0.10.0
libtpu: 0.0.40
codegen_flags: <defaults>
</compile_context>

<pallas_src>
import math

import jax
import jax.numpy as jnp
from jax.experimental import pallas as pl
from jax.experimental.pallas import tpu as pltpu


def _round_up(a, b):
    return -(-a // b) * b


def _conv1x1_bn_kernel(x_ref, w_ref, shift_ref, o_ref):
    # x_ref:     (TM, Cin)    streamed tile of flattened inputs
    # w_ref:     (Cin, Cout)  BN-scale-folded, pre-transposed weight (resident)
    # shift_ref: (1, Cout)    folded BN shift = beta - mean * gamma/sqrt(var+eps)
    # o_ref:     (TM, Cout)
    acc = jnp.dot(x_ref[...], w_ref[...], preferred_element_type=jnp.float32)
    o_ref[...] = (acc + shift_ref[...]).astype(o_ref.dtype)


def conv1x1_bn(x, weight, gamma, beta, running_mean, running_var,
               eps=1e-5, tile_m=8192, compute_dtype=jnp.bfloat16):
    """Fused 1x1 conv (Linear, no bias) + inference-mode BatchNorm1d.

    x:      (..., Cin)
    weight: (Cout, Cin)  — torch.nn.Linear layout
    gamma, beta, running_mean, running_var: (Cout,)
    compute_dtype: dtype for x / weight inside the kernel (None = keep x.dtype).
    Output dtype matches x.dtype.
    """
    cin = x.shape[-1]
    cout = weight.shape[0]
    lead_shape = x.shape[:-1]
    m = int(math.prod(lead_shape)) if lead_shape else 1
    x2d = x.reshape(m, cin)
    out_dtype = x.dtype

    # Fold BN (eval mode): scale into the weight (once, in f32, on a tiny
    # index-invariant tensor), shift stays a per-channel f32 add.
    scale = (gamma / jnp.sqrt(running_var + eps)).astype(jnp.float32)
    shift = (beta.astype(jnp.float32) - running_mean.astype(jnp.float32) * scale)
    w_folded = weight.astype(jnp.float32) * scale[:, None]     # (Cout, Cin)
    w_t = w_folded.T                                            # (Cin, Cout)
    shift2d = shift.reshape(1, cout)

    # Cast streamed operands to the compute dtype (bf16 by default) to halve
    # input HBM traffic; accumulation and the epilogue remain f32.
    if compute_dtype is not None and jnp.dtype(compute_dtype) != x2d.dtype:
        x2d = x2d.astype(compute_dtype)
        w_t = w_t.astype(compute_dtype)
    in_dtype = x2d.dtype
    in_bytes = jnp.dtype(in_dtype).itemsize
    out_bytes = jnp.dtype(out_dtype).itemsize

    # --- Tile selection (lane-padding aware) -------------------------------
    sub = 16 if in_dtype == jnp.bfloat16 else 8      # sublane granularity
    cin_pad = _round_up(cin, 128)
    cout_pad = _round_up(cout, 128)

    # Double-buffered, lane-padded VMEM bytes per streamed row (x in + out).
    per_row = 2 * cin_pad * in_bytes + 2 * cout_pad * out_bytes
    tile_budget = 24 << 20                           # leave headroom under 32 MiB
    tm_cap = max(sub, (tile_budget // per_row) // sub * sub)

    tm = max(1, min(int(tile_m), m, tm_cap))
    if m > sub:
        # Keep the grid length >= 2 and even so both v7x TensorCores get work
        # (neutral on single-TC v5e/v6e).
        nblk = pl.cdiv(m, tm)
        if nblk < 2:
            nblk = 2
        if nblk % 2:
            nblk += 1
        tm = _round_up(pl.cdiv(m, nblk), sub)
    tm = max(sub, min(tm, _round_up(m, sub)))
    grid = (pl.cdiv(m, tm),)

    # VMEM request: double-buffered lane-padded x/out tiles + resident
    # (folded) weight + shift + headroom, clamped to 32 MiB (v7x-safe).
    w_vmem = 2 * _round_up(cin, 8) * cout_pad * in_bytes
    shift_vmem = 2 * 8 * cout_pad * 4
    vmem_bytes = (2 * tm * cin_pad * in_bytes
                  + 2 * tm * cout_pad * out_bytes
                  + w_vmem + shift_vmem + (2 << 20))
    vmem_bytes = int(min(max(vmem_bytes, 8 << 20), 32 << 20))

    cost = pl.CostEstimate(
        flops=2 * m * cin * cout,
        bytes_accessed=(m * cin * in_bytes            # streamed x (bf16/f32)
                        + cin * cout * in_bytes       # resident weight
                        + cout * 4                    # f32 shift
                        + m * cout * out_bytes),      # output writeback
        transcendentals=0,
    )

    out2d = pl.pallas_call(
        _conv1x1_bn_kernel,
        out_shape=jax.ShapeDtypeStruct((m, cout), out_dtype),
        grid_spec=pltpu.PrefetchScalarGridSpec(
            num_scalar_prefetch=0,
            grid=grid,
            in_specs=[
                pl.BlockSpec((tm, cin), lambda i: (i, 0)),    # streamed x tile
                pl.BlockSpec((cin, cout), lambda i: (0, 0)),  # resident weight
                pl.BlockSpec((1, cout), lambda i: (0, 0)),    # resident BN shift
            ],
            out_specs=pl.BlockSpec((tm, cout), lambda i: (i, 0)),
        ),
        compiler_params=pltpu.CompilerParams(
            dimension_semantics=("parallel",),   # megacore sharding on v7x
            vmem_limit_bytes=vmem_bytes,
        ),
        cost_estimate=cost,
    )(x2d, w_t, shift2d)

    return out2d.reshape(*lead_shape, cout)


def conv1x1_bn_ref(x, weight, gamma, beta, running_mean, running_var, eps=1e-5):
    y = jnp.einsum("...i,oi->...o", x, weight)
    return (y - running_mean) / jnp.sqrt(running_var + eps) * gamma + beta


if __name__ == "__main__":
    key = jax.random.PRNGKey(0)
    kx, kw, kg, kb, km, kv = jax.random.split(key, 6)

    # Octree-style input: (num_nodes, channel_in); BatchNorm1d over channel_out.
    num_nodes, channel_in, channel_out = 4096, 16, 32

    x = jax.random.normal(kx, (num_nodes, channel_in), dtype=jnp.float32)

    # Deterministic init mimicking torch.nn.Linear (kaiming-uniform bound).
    bound = 1.0 / math.sqrt(channel_in)
    weight = jax.random.uniform(
        kw, (channel_out, channel_in), minval=-bound, maxval=bound,
        dtype=jnp.float32)

    # BatchNorm parameters / running statistics (inference mode).
    gamma = jax.random.uniform(kg, (channel_out,), minval=0.5, maxval=1.5,
                               dtype=jnp.float32)
    beta = jax.random.normal(kb, (channel_out,), dtype=jnp.float32) * 0.1
    running_mean = jax.random.normal(km, (channel_out,), dtype=jnp.float32) * 0.1
    running_var = jax.random.uniform(kv, (channel_out,), minval=0.5, maxval=1.5,
                                     dtype=jnp.float32)

    ref = conv1x1_bn_ref(x, weight, gamma, beta, running_mean, running_var)

    # 1) f32 path: tight correctness check.
    out_f32 = conv1x1_bn(x, weight, gamma, beta, running_mean, running_var,
                         compute_dtype=None)
    out_f32 = jax.block_until_ready(out_f32)
    assert out_f32.shape == (num_nodes, channel_out)
    assert out_f32.dtype == jnp.float32
    assert jnp.allclose(out_f32, ref, atol=1e-4, rtol=1e-4), (
        float(jnp.max(jnp.abs(out_f32 - ref))))

    # 2) bf16 compute path (default, halves HBM input traffic): looser check
    #    against the f32 reference.
    out_bf16 = conv1x1_bn(x, weight, gamma, beta, running_mean, running_var)
    out_bf16 = jax.block_until_ready(out_bf16)
    assert out_bf16.shape == (num_nodes, channel_out)
    assert out_bf16.dtype == jnp.float32
    assert jnp.allclose(out_bf16, ref, atol=5e-2, rtol=5e-2), (
        float(jnp.max(jnp.abs(out_bf16 - ref))))

    print("KERNEL_OK")
</pallas_src>

<mosaic_0001>
module attributes {stable_mosaic.version = 11 : i64} {
  func.func @_conv1x1_bn_kernel(%arg0: i32, %arg1: memref<2048x16xf32, #tpu.memory_space<vmem>>, %arg2: memref<16x32xf32, #tpu.memory_space<vmem>>, %arg3: memref<1x32xf32, #tpu.memory_space<vmem>>, %arg4: memref<2048x32xf32, #tpu.memory_space<vmem>>) attributes {dimension_semantics = [#tpu.dimension_semantics<parallel>], iteration_bounds = array<i64: 2>, scalar_prefetch = 0 : i64, scratch_operands = 0 : i64, tpu.core_type = #tpu.core_type<tc>, window_params = [{transform_indices = @transform_0, window_bounds = array<i64: 2048, 16>}, {pipeline_mode = #tpu.pipeline_mode<synchronous>, transform_indices = @transform_1, window_bounds = array<i64: 16, 32>}, {pipeline_mode = #tpu.pipeline_mode<synchronous>, transform_indices = @transform_2, window_bounds = array<i64: 1, 32>}, {transform_indices = @transform_3, window_bounds = array<i64: 2048, 32>}]} {
    %c0 = arith.constant 0 : index
    %c0_0 = arith.constant 0 : index
    %0 = vector.load %arg1[%c0, %c0_0] : memref<2048x16xf32, #tpu.memory_space<vmem>>, vector<2048x16xf32>
    %c0_1 = arith.constant 0 : index
    %c0_2 = arith.constant 0 : index
    %1 = vector.load %arg2[%c0_1, %c0_2] : memref<16x32xf32, #tpu.memory_space<vmem>>, vector<16x32xf32>
    %cst = arith.constant dense<0.000000e+00> : vector<2048x32xf32>
    %2 = tpu.matmul %0, %1, %cst {dimension_numbers = #tpu.dot_dimension_numbers<[1], [0], [0], [1], [0, 0, 1, 1], [], []>} : vector<2048x16xf32>, vector<16x32xf32>, vector<2048x32xf32> -> vector<2048x32xf32>
    %c0_3 = arith.constant 0 : index
    %c0_4 = arith.constant 0 : index
    %3 = vector.load %arg3[%c0_3, %c0_4] : memref<1x32xf32, #tpu.memory_space<vmem>>, vector<1x32xf32>
    %4 = vector.broadcast %3 : vector<1x32xf32> to vector<2048x32xf32>
    %5 = arith.addf %2, %4 : vector<2048x32xf32>
    %c0_5 = arith.constant 0 : index
    %c0_6 = arith.constant 0 : index
    %6 = vector.load %arg4[%c0_5, %c0_6] : memref<2048x32xf32, #tpu.memory_space<vmem>>, vector<2048x32xf32>
    tpu.vector_store %arg4[%c0_5, %c0_6], %5 {strides = array<i32>} : memref<2048x32xf32, #tpu.memory_space<vmem>>, vector<2048x32xf32>,
    return
  }
  func.func @transform_0(%arg0: i32) -> (i32, i32) {
    %c0_i32 = arith.constant 0 : i32
    %c0_i32_0 = arith.constant 0 : i32
    return %arg0, %c0_i32 : i32, i32
  }
  func.func @transform_1(%arg0: i32) -> (i32, i32) {
    %c0_i32 = arith.constant 0 : i32
    %c0_i32_0 = arith.constant 0 : i32
    %c0_i32_1 = arith.constant 0 : i32
    return %c0_i32, %c0_i32_0 : i32, i32
  }
  func.func @transform_2(%arg0: i32) -> (i32, i32) {
    %c0_i32 = arith.constant 0 : i32
    %c0_i32_0 = arith.constant 0 : i32
    %c0_i32_1 = arith.constant 0 : i32
    return %c0_i32, %c0_i32_0 : i32, i32
  }
  func.func @transform_3(%arg0: i32) -> (i32, i32) {
    %c0_i32 = arith.constant 0 : i32
    %c0_i32_0 = arith.constant 0 : i32
    return %arg0, %c0_i32 : i32, i32
  }
}

</mosaic_0001>

<bundles_post_ra>
// kernel: tpu_custom_call.1
= control target key start
LH: loop header
LB: loop body
LE: loop exit
PB: predicated region body
PF: predicated region fallthrough
CT: control target
= control target key end

     0   :  { %s3821_s12 = smov 0   ;;  %s5145_s0 = inlined_call_operand.vmem [shape: f32[4096,16], index: 0, kind: input, shape index: {}]   ;;  %s5146_s1 = inlined_call_operand.vmem [shape: f32[16,32], index: 1, kind: input, shape index: {}]   ;;  %s5147_s2 = inlined_call_operand.vmem [shape: f32[1,32], index: 2, kind: input, shape index: {}]   ;;  %s5148_s3 = inlined_call_operand.vmem [shape: f32[4096,32], index: 3, kind: output, shape index: {}]  }
   0x1 LB: > { %s2866_s13 = sadd.s32 4294967295, %s3799_s12   ;;  %p2870_p0 = scmp.ge.s32.totalorder %s3799_s12, 1  ;;  %s3799_s12 = sphi %s3821_s12, %s13_s12  }
   0x2   : > { %p138_p1 = scmp.lt.s32.totalorder %s3799_s12, 3 }
   0x4   : > { %p139_p2 = pnand %p2870_p0, %p138_p1 }
   0x5   : > { %s2871_s18 = sshll.u32 (!%p139_p2), %s2866_s13, 8 }
   0x6   : > { %142 = sbr.rel (%p139_p2) target bundleno = 467 (0x1d3), region = 32  ;;  %p163_p3 = scmp.lt.s32.totalorder (!%p139_p2), %s2871_s18, 511 }
   0xb   : > { %v431_v0 = vld [vmem:[%s5146_s1 + $0x8] sm:$0xff]  ;;  %v430_v1 = vld [vmem:[%s5146_s1] sm:$0xff]  ;;  %s5150_s18 = smov (!%p163_p3, %s2871_s18), 511  ;;  %vm439_vm0 = vcmask 130048   ;;  %vm2553_vm1 = vcmask 261120  }
   0xc   : > { %3392 = vmatprep.subr.mxu0 %v431_v0  ;;  %3780 = vmatprep.subr.mxu1 %v431_v0  ;;  %s2872_s19 = sshll.u32 %s5150_s18, 3 }
   0xd   : > { %3393 = vmatpush3.msra.mxu0 %v431_v0  ;;  %3782 = vmatpush3.msra.mxu1 %v431_v0  ;;  %s3843_s22 = scalar_lea.vmem %s5145_s0, %s2872_s19  ;;  %s4247_s27 = scalar_lea.vmem %s5148_s3, %s2872_s19 }
   0xe   : > { %3394 = vmatprep.subr.mxu0 %v430_v1  ;;  %3781 = vmatprep.subr.mxu1 %v430_v1  ;;  %v174_v2 = vld [vmem:[%s3843_s22] sm:$0xff]  ;;  %v175_v4 = vld [vmem:[%s3843_s22 + $0x8] sm:$0xff]  ;;  %v176_v6 = vld [vmem:[%s3843_s22 + $0x10] sm:$0xff] }
   0xf   : > { %3395 = vmatpush3.msra.mxu0 %v430_v1  ;;  %3783 = vmatpush3.msra.mxu1 %v430_v1  ;;  %v302_v3 = vld [vmem:[%s3843_s22 + $0x400] sm:$0xff]  ;;  %v303_v5 = vld [vmem:[%s3843_s22 + $0x408] sm:$0xff]  ;;  %v304_v7 = vld [vmem:[%s3843_s22 + $0x410] sm:$0xff] }
  0x10   : > { %3396 = vmatprep.mubr.msk.f32.mxu0 %vm439_vm0, %v174_v2  ;;  %3588 = vmatprep.mubr.msk.f32.mxu1 %vm439_vm0, %v302_v3  ;;  %v177_v8 = vld [vmem:[%s3843_s22 + $0x18] sm:$0xff]  ;;  %v178_v10 = vld [vmem:[%s3843_s22 + $0x20] sm:$0xff]  ;;  %v179_v12 = vld [vmem:[%s3843_s22 + $0x28] sm:$0xff] }
  0x11   : > { %3397 = vmatmul.mubr.msk.f32.vlgmr.msra.gmra.mxu0 %vm439_vm0, %v175_v4  ;;  %3589 = vmatmul.mubr.msk.f32.vlgmr.msra.gmra.mxu1 %vm439_vm0, %v303_v5  ;;  %v305_v9 = vld [vmem:[%s3843_s22 + $0x418] sm:$0xff]  ;;  %v306_v11 = vld [vmem:[%s3843_s22 + $0x420] sm:$0xff]  ;;  %v307_v13 = vld [vmem:[%s3843_s22 + $0x428] sm:$0xff] }
  0x12   : > { %3399 = vmatprep.mubr.msk.f32.mxu0 %vm439_vm0, %v176_v6  ;;  %3591 = vmatprep.mubr.msk.f32.mxu1 %vm439_vm0, %v304_v7  ;;  %v180_v14 = vld [vmem:[%s3843_s22 + $0x30] sm:$0xff]  ;;  %v181_v16 = vld [vmem:[%s3843_s22 + $0x38] sm:$0xff]  ;;  %v182_v18 = vld [vmem:[%s3843_s22 + $0x40] sm:$0xff] }
  0x13   : > { %v308_v15 = vld [vmem:[%s3843_s22 + $0x430] sm:$0xff]  ;;  %v309_v17 = vld [vmem:[%s3843_s22 + $0x438] sm:$0xff]  ;;  %v310_v19 = vld [vmem:[%s3843_s22 + $0x440] sm:$0xff] }
  0x14   : > { %v183_v20 = vld [vmem:[%s3843_s22 + $0x48] sm:$0xff]  ;;  %v184_v22 = vld [vmem:[%s3843_s22 + $0x50] sm:$0xff]  ;;  %v185_v24 = vld [vmem:[%s3843_s22 + $0x58] sm:$0xff] }
  0x15   : > { %3400 = vmatmul.mubr.msk.f32.gmra.mxu0 %vm439_vm0, %v177_v8  ;;  %3592 = vmatmul.mubr.msk.f32.gmra.mxu1 %vm439_vm0, %v305_v9  ;;  %v311_v21 = vld [vmem:[%s3843_s22 + $0x448] sm:$0xff]  ;;  %v312_v23 = vld [vmem:[%s3843_s22 + $0x450] sm:$0xff]  ;;  %v313_v25 = vld [vmem:[%s3843_s22 + $0x458] sm:$0xff] }
  0x16   : > { %3402 = vmatprep.mubr.msk.f32.mxu0 %vm439_vm0, %v178_v10  ;;  %3594 = vmatprep.mubr.msk.f32.mxu1 %vm439_vm0, %v306_v11  ;;  %v186_v26 = vld [vmem:[%s3843_s22 + $0x60] sm:$0xff]  ;;  %v187_v28 = vld [vmem:[%s3843_s22 + $0x68] sm:$0xff]  ;;  %v188_v30 = vld [vmem:[%s3843_s22 + $0x70] sm:$0xff] }
  0x17   : > { %v314_v27 = vld [vmem:[%s3843_s22 + $0x460] sm:$0xff]  ;;  %v315_v29 = vld [vmem:[%s3843_s22 + $0x468] sm:$0xff]  ;;  %v316_v31 = vld [vmem:[%s3843_s22 + $0x470] sm:$0xff] }
  0x18   : > { %v189_v32 = vld [vmem:[%s3843_s22 + $0x78] sm:$0xff]  ;;  %v190_v34 = vld [vmem:[%s3843_s22 + $0x80] sm:$0xff]  ;;  %v191_v36 = vld [vmem:[%s3843_s22 + $0x88] sm:$0xff] }
  0x19   : > { %3403 = vmatmul.mubr.msk.f32.gmra.mxu0 %vm439_vm0, %v179_v12  ;;  %3595 = vmatmul.mubr.msk.f32.gmra.mxu1 %vm439_vm0, %v307_v13  ;;  %v317_v33 = vld [vmem:[%s3843_s22 + $0x478] sm:$0xff]  ;;  %v318_v35 = vld [vmem:[%s3843_s22 + $0x480] sm:$0xff]  ;;  %v319_v37 = vld [vmem:[%s3843_s22 + $0x488] sm:$0xff] }
  0x1a   : > { %3405 = vmatprep.mubr.msk.f32.mxu0 %vm439_vm0, %v180_v14  ;;  %3597 = vmatprep.mubr.msk.f32.mxu1 %vm439_vm0, %v308_v15  ;;  %v192_v38 = vld [vmem:[%s3843_s22 + $0x90] sm:$0xff]  ;;  %v193_v40 = vld [vmem:[%s3843_s22 + $0x98] sm:$0xff]  ;;  %v194_v42 = vld [vmem:[%s3843_s22 + $0xa0] sm:$0xff] }
  0x1b   : > { %v320_v39 = vld [vmem:[%s3843_s22 + $0x490] sm:$0xff]  ;;  %v321_v41 = vld [vmem:[%s3843_s22 + $0x498] sm:$0xff]  ;;  %v322_v43 = vld [vmem:[%s3843_s22 + $0x4a0] sm:$0xff] }
  0x1c   : > { %v195_v44 = vld [vmem:[%s3843_s22 + $0xa8] sm:$0xff]  ;;  %v196_v46 = vld [vmem:[%s3843_s22 + $0xb0] sm:$0xff]  ;;  %v197_v48 = vld [vmem:[%s3843_s22 + $0xb8] sm:$0xff] }
  0x1d   : > { %3406 = vmatmul.mubr.msk.f32.gmra.mxu0 %vm439_vm0, %v181_v16  ;;  %3598 = vmatmul.mubr.msk.f32.gmra.mxu1 %vm439_vm0, %v309_v17  ;;  %v323_v45 = vld [vmem:[%s3843_s22 + $0x4a8] sm:$0xff]  ;;  %v324_v47 = vld [vmem:[%s3843_s22 + $0x4b0] sm:$0xff]  ;;  %v325_v49 = vld [vmem:[%s3843_s22 + $0x4b8] sm:$0xff] }
  0x1e   : > { %3408 = vmatprep.mubr.msk.f32.mxu0 %vm439_vm0, %v182_v18  ;;  %3600 = vmatprep.mubr.msk.f32.mxu1 %vm439_vm0, %v310_v19  ;;  %v198_v50 = vld [vmem:[%s3843_s22 + $0xc0] sm:$0xff]  ;;  %v199_v52 = vld [vmem:[%s3843_s22 + $0xc8] sm:$0xff]  ;;  %v200_v54 = vld [vmem:[%s3843_s22 + $0xd0] sm:$0xff] }
  0x1f   : > { %v326_v51 = vld [vmem:[%s3843_s22 + $0x4c0] sm:$0xff]  ;;  %v327_v53 = vld [vmem:[%s3843_s22 + $0x4c8] sm:$0xff]  ;;  %v328_v55 = vld [vmem:[%s3843_s22 + $0x4d0] sm:$0xff] }
  0x20   : > { %v201_v56 = vld [vmem:[%s3843_s22 + $0xd8] sm:$0xff]  ;;  %v202_v58 = vld [vmem:[%s3843_s22 + $0xe0] sm:$0xff]  ;;  %v203_v60 = vld [vmem:[%s3843_s22 + $0xe8] sm:$0xff] }
  0x21   : > { %3409 = vmatmul.mubr.msk.f32.gmra.mxu0 %vm439_vm0, %v183_v20  ;;  %3601 = vmatmul.mubr.msk.f32.gmra.mxu1 %vm439_vm0, %v311_v21  ;;  %v329_v57 = vld [vmem:[%s3843_s22 + $0x4d8] sm:$0xff]  ;;  %v330_v59 = vld [vmem:[%s3843_s22 + $0x4e0] sm:$0xff]  ;;  %v331_v61 = vld [vmem:[%s3843_s22 + $0x4e8] sm:$0xff] }
  0x22   : > { %3411 = vmatprep.mubr.msk.f32.mxu0 %vm439_vm0, %v184_v22  ;;  %3603 = vmatprep.mubr.msk.f32.mxu1 %vm439_vm0, %v312_v23  ;;  %v204_v62 = vld [vmem:[%s3843_s22 + $0xf0] sm:$0xff]  ;;  %v205_v0 = vld [vmem:[%s3843_s22 + $0xf8] sm:$0xff]  ;;  %v206_v2 = vld [vmem:[%s3843_s22 + $0x100] sm:$0xff] }
  0x23   : > { %v332_v63 = vld [vmem:[%s3843_s22 + $0x4f0] sm:$0xff]  ;;  %v333_v1 = vld [vmem:[%s3843_s22 + $0x4f8] sm:$0xff]  ;;  %v334_v3 = vld [vmem:[%s3843_s22 + $0x500] sm:$0xff] }
  0x24   : > { %v207_v4 = vld [vmem:[%s3843_s22 + $0x108] sm:$0xff]  ;;  %v208_v6 = vld [vmem:[%s3843_s22 + $0x110] sm:$0xff]  ;;  %v209_v8 = vld [vmem:[%s3843_s22 + $0x118] sm:$0xff] }
  0x25   : > { %3412 = vmatmul.mubr.msk.f32.gmra.mxu0 %vm439_vm0, %v185_v24  ;;  %3604 = vmatmul.mubr.msk.f32.gmra.mxu1 %vm439_vm0, %v313_v25  ;;  %v335_v5 = vld [vmem:[%s3843_s22 + $0x508] sm:$0xff]  ;;  %v336_v7 = vld [vmem:[%s3843_s22 + $0x510] sm:$0xff]  ;;  %v337_v9 = vld [vmem:[%s3843_s22 + $0x518] sm:$0xff] }
  0x26   : > { %3414 = vmatprep.mubr.msk.f32.mxu0 %vm439_vm0, %v186_v26  ;;  %3606 = vmatprep.mubr.msk.f32.mxu1 %vm439_vm0, %v314_v27  ;;  %v210_v10 = vld [vmem:[%s3843_s22 + $0x120] sm:$0xff]  ;;  %v211_v12 = vld [vmem:[%s3843_s22 + $0x128] sm:$0xff]  ;;  %v212_v14 = vld [vmem:[%s3843_s22 + $0x130] sm:$0xff] }
  0x27   : > { %v338_v11 = vld [vmem:[%s3843_s22 + $0x520] sm:$0xff]  ;;  %v339_v13 = vld [vmem:[%s3843_s22 + $0x528] sm:$0xff]  ;;  %v340_v15 = vld [vmem:[%s3843_s22 + $0x530] sm:$0xff] }
  0x28   : > { %v213_v16 = vld [vmem:[%s3843_s22 + $0x138] sm:$0xff]  ;;  %v214_v18 = vld [vmem:[%s3843_s22 + $0x140] sm:$0xff]  ;;  %v215_v20 = vld [vmem:[%s3843_s22 + $0x148] sm:$0xff] }
  0x29   : > { %3415 = vmatmul.mubr.msk.f32.gmra.mxu0 %vm439_vm0, %v187_v28  ;;  %3607 = vmatmul.mubr.msk.f32.gmra.mxu1 %vm439_vm0, %v315_v29  ;;  %v341_v17 = vld [vmem:[%s3843_s22 + $0x538] sm:$0xff]  ;;  %v342_v19 = vld [vmem:[%s3843_s22 + $0x540] sm:$0xff]  ;;  %v343_v21 = vld [vmem:[%s3843_s22 + $0x548] sm:$0xff] }
  0x2a   : > { %3417 = vmatprep.mubr.msk.f32.mxu0 %vm439_vm0, %v188_v30  ;;  %3609 = vmatprep.mubr.msk.f32.mxu1 %vm439_vm0, %v316_v31  ;;  %v216_v22 = vld [vmem:[%s3843_s22 + $0x150] sm:$0xff]  ;;  %v217_v24 = vld [vmem:[%s3843_s22 + $0x158] sm:$0xff]  ;;  %v218_v26 = vld [vmem:[%s3843_s22 + $0x160] sm:$0xff] }
  0x2b   : > { %v344_v23 = vld [vmem:[%s3843_s22 + $0x550] sm:$0xff]  ;;  %v345_v25 = vld [vmem:[%s3843_s22 + $0x558] sm:$0xff]  ;;  %v346_v27 = vld [vmem:[%s3843_s22 + $0x560] sm:$0xff] }
  0x2c   : > { %v219_v28 = vld [vmem:[%s3843_s22 + $0x168] sm:$0xff]  ;;  %v220_v30 = vld [vmem:[%s3843_s22 + $0x170] sm:$0xff] }
  0x2d   : > { %3418 = vmatmul.mubr.msk.f32.gmra.mxu0 %vm439_vm0, %v189_v32  ;;  %3610 = vmatmul.mubr.msk.f32.gmra.mxu1 %vm439_vm0, %v317_v33  ;;  %v347_v29 = vld [vmem:[%s3843_s22 + $0x568] sm:$0xff]  ;;  %v348_v31 = vld [vmem:[%s3843_s22 + $0x570] sm:$0xff]  ;;  %v221_v32 = vld [vmem:[%s3843_s22 + $0x178] sm:$0xff] }
  0x2e   : > { %3420 = vmatprep.mubr.msk.f32.mxu0 %vm439_vm0, %v190_v34  ;;  %3612 = vmatprep.mubr.msk.f32.mxu1 %vm439_vm0, %v318_v35  ;;  %v349_v33 = vld [vmem:[%s3843_s22 + $0x578] sm:$0xff]  ;;  %v222_v34 = vld [vmem:[%s3843_s22 + $0x180] sm:$0xff] }
  0x2f   : > { %v350_v35 = vld [vmem:[%s3843_s22 + $0x580] sm:$0xff] }
  0x31   : > { %3421 = vmatmul.mubr.msk.f32.gmra.mxu0 %vm439_vm0, %v191_v36  ;;  %3613 = vmatmul.mubr.msk.f32.gmra.mxu1 %vm439_vm0, %v319_v37  ;;  %v223_v36 = vld [vmem:[%s3843_s22 + $0x188] sm:$0xff] }
  0x32   : > { %3423 = vmatprep.mubr.msk.f32.mxu0 %vm439_vm0, %v192_v38  ;;  %3615 = vmatprep.mubr.msk.f32.mxu1 %vm439_vm0, %v320_v39  ;;  %v351_v37 = vld [vmem:[%s3843_s22 + $0x588] sm:$0xff]  ;;  %v224_v38 = vld [vmem:[%s3843_s22 + $0x190] sm:$0xff] }
  0x33   : > { %v352_v39 = vld [vmem:[%s3843_s22 + $0x590] sm:$0xff] }
  0x35   : > { %3424 = vmatmul.mubr.msk.f32.gmra.mxu0 %vm439_vm0, %v193_v40  ;;  %3616 = vmatmul.mubr.msk.f32.gmra.mxu1 %vm439_vm0, %v321_v41  ;;  %v225_v40 = vld [vmem:[%s3843_s22 + $0x198] sm:$0xff] }
  0x36   : > { %3426 = vmatprep.mubr.msk.f32.mxu0 %vm439_vm0, %v194_v42  ;;  %3618 = vmatprep.mubr.msk.f32.mxu1 %vm439_vm0, %v322_v43  ;;  %v353_v41 = vld [vmem:[%s3843_s22 + $0x598] sm:$0xff]  ;;  %v226_v42 = vld [vmem:[%s3843_s22 + $0x1a0] sm:$0xff] }
  0x37   : > { %v354_v43 = vld [vmem:[%s3843_s22 + $0x5a0] sm:$0xff] }
  0x39   : > { %3427 = vmatmul.mubr.msk.f32.gmra.mxu0 %vm439_vm0, %v195_v44  ;;  %3619 = vmatmul.mubr.msk.f32.gmra.mxu1 %vm439_vm0, %v323_v45  ;;  %v227_v44 = vld [vmem:[%s3843_s22 + $0x1a8] sm:$0xff] }
  0x3a   : > { %3429 = vmatprep.mubr.msk.f32.mxu0 %vm439_vm0, %v196_v46  ;;  %3621 = vmatprep.mubr.msk.f32.mxu1 %vm439_vm0, %v324_v47  ;;  %v355_v45 = vld [vmem:[%s3843_s22 + $0x5a8] sm:$0xff]  ;;  %v228_v46 = vld [vmem:[%s3843_s22 + $0x1b0] sm:$0xff] }
  0x3b   : > { %v356_v47 = vld [vmem:[%s3843_s22 + $0x5b0] sm:$0xff] }
  0x3d   : > { %3430 = vmatmul.mubr.msk.f32.gmra.mxu0 %vm439_vm0, %v197_v48  ;;  %3622 = vmatmul.mubr.msk.f32.gmra.mxu1 %vm439_vm0, %v325_v49  ;;  %v229_v48 = vld [vmem:[%s3843_s22 + $0x1b8] sm:$0xff] }
  0x3e   : > { %3432 = vmatprep.mubr.msk.f32.mxu0 %vm439_vm0, %v198_v50  ;;  %3624 = vmatprep.mubr.msk.f32.mxu1 %vm439_vm0, %v326_v51  ;;  %v357_v49 = vld [vmem:[%s3843_s22 + $0x5b8] sm:$0xff]  ;;  %v230_v50 = vld [vmem:[%s3843_s22 + $0x1c0] sm:$0xff] }
  0x3f   : > { %v358_v51 = vld [vmem:[%s3843_s22 + $0x5c0] sm:$0xff] }
  0x41   : > { %3433 = vmatmul.mubr.msk.f32.gmra.mxu0 %vm439_vm0, %v199_v52  ;;  %3625 = vmatmul.mubr.msk.f32.gmra.mxu1 %vm439_vm0, %v327_v53  ;;  %v231_v52 = vld [vmem:[%s3843_s22 + $0x1c8] sm:$0xff] }
  0x42   : > { %3435 = vmatprep.mubr.msk.f32.mxu0 %vm439_vm0, %v200_v54  ;;  %3627 = vmatprep.mubr.msk.f32.mxu1 %vm439_vm0, %v328_v55  ;;  %v359_v53 = vld [vmem:[%s3843_s22 + $0x5c8] sm:$0xff]  ;;  %v232_v54 = vld [vmem:[%s3843_s22 + $0x1d0] sm:$0xff] }
  0x43   : > { %v360_v55 = vld [vmem:[%s3843_s22 + $0x5d0] sm:$0xff] }
  0x45   : > { %3436 = vmatmul.mubr.msk.f32.gmra.mxu0 %vm439_vm0, %v201_v56  ;;  %3628 = vmatmul.mubr.msk.f32.gmra.mxu1 %vm439_vm0, %v329_v57  ;;  %v233_v56 = vld [vmem:[%s3843_s22 + $0x1d8] sm:$0xff] }
  0x46   : > { %3438 = vmatprep.mubr.msk.f32.mxu0 %vm439_vm0, %v202_v58  ;;  %3630 = vmatprep.mubr.msk.f32.mxu1 %vm439_vm0, %v330_v59  ;;  %v361_v57 = vld [vmem:[%s3843_s22 + $0x5d8] sm:$0xff]  ;;  %v234_v58 = vld [vmem:[%s3843_s22 + $0x1e0] sm:$0xff] }
  0x47   : > { %v362_v59 = vld [vmem:[%s3843_s22 + $0x5e0] sm:$0xff] }
  0x49   : > { %3439 = vmatmul.mubr.msk.f32.gmra.mxu0 %vm439_vm0, %v203_v60  ;;  %3631 = vmatmul.mubr.msk.f32.gmra.mxu1 %vm439_vm0, %v331_v61  ;;  %v235_v60 = vld [vmem:[%s3843_s22 + $0x1e8] sm:$0xff] }
  0x4a   : > { %3441 = vmatprep.mubr.msk.f32.mxu0 %vm439_vm0, %v204_v62  ;;  %3633 = vmatprep.mubr.msk.f32.mxu1 %vm439_vm0, %v332_v63  ;;  %v363_v61 = vld [vmem:[%s3843_s22 + $0x5e8] sm:$0xff]  ;;  %v236_v62 = vld [vmem:[%s3843_s22 + $0x1f0] sm:$0xff] }
  0x4b   : > { %v364_v63 = vld [vmem:[%s3843_s22 + $0x5f0] sm:$0xff] }
  0x4d   : > { %3442 = vmatmul.mubr.msk.f32.gmra.mxu0 %vm439_vm0, %v205_v0  ;;  %3634 = vmatmul.mubr.msk.f32.gmra.mxu1 %vm439_vm0, %v333_v1  ;;  %v237_v0 = vld [vmem:[%s3843_s22 + $0x1f8] sm:$0xff] }
  0x4e   : > { %3444 = vmatprep.mubr.msk.f32.mxu0 %vm439_vm0, %v206_v2  ;;  %3636 = vmatprep.mubr.msk.f32.mxu1 %vm439_vm0, %v334_v3  ;;  %v365_v1 = vld [vmem:[%s3843_s22 + $0x5f8] sm:$0xff]  ;;  %v238_v2 = vld [vmem:[%s3843_s22 + $0x200] sm:$0xff] }
  0x4f   : > { %v366_v3 = vld [vmem:[%s3843_s22 + $0x600] sm:$0xff] }
  0x51   : > { %3445 = vmatmul.mubr.msk.f32.gmra.mxu0 %vm439_vm0, %v207_v4  ;;  %3637 = vmatmul.mubr.msk.f32.gmra.mxu1 %vm439_vm0, %v335_v5  ;;  %v239_v4 = vld [vmem:[%s3843_s22 + $0x208] sm:$0xff] }
  0x52   : > { %3447 = vmatprep.mubr.msk.f32.mxu0 %vm439_vm0, %v208_v6  ;;  %3639 = vmatprep.mubr.msk.f32.mxu1 %vm439_vm0, %v336_v7  ;;  %v367_v5 = vld [vmem:[%s3843_s22 + $0x608] sm:$0xff]  ;;  %v240_v6 = vld [vmem:[%s3843_s22 + $0x210] sm:$0xff] }
  0x53   : > { %v368_v7 = vld [vmem:[%s3843_s22 + $0x610] sm:$0xff] }
  0x55   : > { %3448 = vmatmul.mubr.msk.f32.gmra.mxu0 %vm439_vm0, %v209_v8  ;;  %3640 = vmatmul.mubr.msk.f32.gmra.mxu1 %vm439_vm0, %v337_v9  ;;  %v241_v8 = vld [vmem:[%s3843_s22 + $0x218] sm:$0xff] }
  0x56   : > { %3450 = vmatprep.mubr.msk.f32.mxu0 %vm439_vm0, %v210_v10  ;;  %3642 = vmatprep.mubr.msk.f32.mxu1 %vm439_vm0, %v338_v11  ;;  %v369_v9 = vld [vmem:[%s3843_s22 + $0x618] sm:$0xff]  ;;  %v242_v10 = vld [vmem:[%s3843_s22 + $0x220] sm:$0xff] }
  0x57   : > { %v370_v11 = vld [vmem:[%s3843_s22 + $0x620] sm:$0xff] }
  0x59   : > { %3451 = vmatmul.mubr.msk.f32.gmra.mxu0 %vm439_vm0, %v211_v12  ;;  %3643 = vmatmul.mubr.msk.f32.gmra.mxu1 %vm439_vm0, %v339_v13  ;;  %v243_v12 = vld [vmem:[%s3843_s22 + $0x228] sm:$0xff] }
  0x5a   : > { %3453 = vmatprep.mubr.msk.f32.mxu0 %vm439_vm0, %v212_v14  ;;  %3645 = vmatprep.mubr.msk.f32.mxu1 %vm439_vm0, %v340_v15  ;;  %v371_v13 = vld [vmem:[%s3843_s22 + $0x628] sm:$0xff]  ;;  %v244_v14 = vld [vmem:[%s3843_s22 + $0x230] sm:$0xff] }
  0x5b   : > { %v372_v15 = vld [vmem:[%s3843_s22 + $0x630] sm:$0xff] }
  0x5d   : > { %3454 = vmatmul.mubr.msk.f32.gmra.mxu0 %vm439_vm0, %v213_v16  ;;  %3646 = vmatmul.mubr.msk.f32.gmra.mxu1 %vm439_vm0, %v341_v17  ;;  %v245_v16 = vld [vmem:[%s3843_s22 + $0x238] sm:$0xff] }
  0x5e   : > { %3456 = vmatprep.mubr.msk.f32.mxu0 %vm439_vm0, %v214_v18  ;;  %3648 = vmatprep.mubr.msk.f32.mxu1 %vm439_vm0, %v342_v19  ;;  %v373_v17 = vld [vmem:[%s3843_s22 + $0x638] sm:$0xff]  ;;  %v246_v18 = vld [vmem:[%s3843_s22 + $0x240] sm:$0xff] }
  0x5f   : > { %v374_v19 = vld [vmem:[%s3843_s22 + $0x640] sm:$0xff] }
  0x61   : > { %3457 = vmatmul.mubr.msk.f32.gmra.mxu0 %vm439_vm0, %v215_v20  ;;  %3649 = vmatmul.mubr.msk.f32.gmra.mxu1 %vm439_vm0, %v343_v21  ;;  %v247_v20 = vld [vmem:[%s3843_s22 + $0x248] sm:$0xff] }
  0x62   : > { %3459 = vmatprep.mubr.msk.f32.mxu0 %vm439_vm0, %v216_v22  ;;  %3651 = vmatprep.mubr.msk.f32.mxu1 %vm439_vm0, %v344_v23  ;;  %v375_v21 = vld [vmem:[%s3843_s22 + $0x648] sm:$0xff]  ;;  %v248_v22 = vld [vmem:[%s3843_s22 + $0x250] sm:$0xff] }
  0x63   : > { %v376_v23 = vld [vmem:[%s3843_s22 + $0x650] sm:$0xff] }
  0x65   : > { %3460 = vmatmul.mubr.msk.f32.gmra.mxu0 %vm439_vm0, %v217_v24  ;;  %3652 = vmatmul.mubr.msk.f32.gmra.mxu1 %vm439_vm0, %v345_v25  ;;  %v249_v24 = vld [vmem:[%s3843_s22 + $0x258] sm:$0xff] }
  0x66   : > { %3462 = vmatprep.mubr.msk.f32.mxu0 %vm439_vm0, %v218_v26  ;;  %3654 = vmatprep.mubr.msk.f32.mxu1 %vm439_vm0, %v346_v27  ;;  %v377_v25 = vld [vmem:[%s3843_s22 + $0x658] sm:$0xff]  ;;  %v250_v26 = vld [vmem:[%s3843_s22 + $0x260] sm:$0xff] }
  0x67   : > { %v378_v27 = vld [vmem:[%s3843_s22 + $0x660] sm:$0xff] }
  0x69   : > { %3463 = vmatmul.mubr.msk.f32.gmra.mxu0 %vm439_vm0, %v219_v28  ;;  %3655 = vmatmul.mubr.msk.f32.gmra.mxu1 %vm439_vm0, %v347_v29  ;;  %v251_v28 = vld [vmem:[%s3843_s22 + $0x268] sm:$0xff] }
  0x6a   : > { %3465 = vmatprep.mubr.msk.f32.mxu0 %vm439_vm0, %v220_v30  ;;  %3657 = vmatprep.mubr.msk.f32.mxu1 %vm439_vm0, %v348_v31  ;;  %v379_v29 = vld [vmem:[%s3843_s22 + $0x668] sm:$0xff]  ;;  %v252_v30 = vld [vmem:[%s3843_s22 + $0x270] sm:$0xff] }
  0x6b   : > { %v380_v31 = vld [vmem:[%s3843_s22 + $0x670] sm:$0xff] }
  0x6d   : > { %3466 = vmatmul.mubr.msk.f32.gmra.mxu0 %vm439_vm0, %v221_v32  ;;  %3658 = vmatmul.mubr.msk.f32.gmra.mxu1 %vm439_vm0, %v349_v33  ;;  %v253_v32 = vld [vmem:[%s3843_s22 + $0x278] sm:$0xff] }
  0x6e   : > { %3468 = vmatprep.mubr.msk.f32.mxu0 %vm439_vm0, %v222_v34  ;;  %3660 = vmatprep.mubr.msk.f32.mxu1 %vm439_vm0, %v350_v35  ;;  %v381_v33 = vld [vmem:[%s3843_s22 + $0x678] sm:$0xff]  ;;  %v254_v34 = vld [vmem:[%s3843_s22 + $0x280] sm:$0xff] }
  0x6f   : > { %v382_v35 = vld [vmem:[%s3843_s22 + $0x680] sm:$0xff] }
  0x71   : > { %3469 = vmatmul.mubr.msk.f32.gmra.mxu0 %vm439_vm0, %v223_v36  ;;  %3661 = vmatmul.mubr.msk.f32.gmra.mxu1 %vm439_vm0, %v351_v37  ;;  %v255_v36 = vld [vmem:[%s3843_s22 + $0x288] sm:$0xff] }
  0x72   : > { %3471 = vmatprep.mubr.msk.f32.mxu0 %vm439_vm0, %v224_v38  ;;  %3663 = vmatprep.mubr.msk.f32.mxu1 %vm439_vm0, %v352_v39  ;;  %v383_v37 = vld [vmem:[%s3843_s22 + $0x688] sm:$0xff]  ;;  %v256_v38 = vld [vmem:[%s3843_s22 + $0x290] sm:$0xff] }
  0x73   : > { %v384_v39 = vld [vmem:[%s3843_s22 + $0x690] sm:$0xff] }
  0x75   : > { %3472 = vmatmul.mubr.msk.f32.gmra.mxu0 %vm439_vm0, %v225_v40  ;;  %3664 = vmatmul.mubr.msk.f32.gmra.mxu1 %vm439_vm0, %v353_v41  ;;  %v257_v40 = vld [vmem:[%s3843_s22 + $0x298] sm:$0xff] }
  0x76   : > { %3474 = vmatprep.mubr.msk.f32.mxu0 %vm439_vm0, %v226_v42  ;;  %3666 = vmatprep.mubr.msk.f32.mxu1 %vm439_vm0, %v354_v43  ;;  %v385_v41 = vld [vmem:[%s3843_s22 + $0x698] sm:$0xff]  ;;  %v258_v42 = vld [vmem:[%s3843_s22 + $0x2a0] sm:$0xff] }
  0x77   : > { %v386_v43 = vld [vmem:[%s3843_s22 + $0x6a0] sm:$0xff] }
  0x79   : > { %3475 = vmatmul.mubr.msk.f32.gmra.mxu0 %vm439_vm0, %v227_v44  ;;  %3667 = vmatmul.mubr.msk.f32.gmra.mxu1 %vm439_vm0, %v355_v45  ;;  %v259_v44 = vld [vmem:[%s3843_s22 + $0x2a8] sm:$0xff] }
  0x7a   : > { %3477 = vmatprep.mubr.msk.f32.mxu0 %vm439_vm0, %v228_v46  ;;  %3669 = vmatprep.mubr.msk.f32.mxu1 %vm439_vm0, %v356_v47  ;;  %v387_v45 = vld [vmem:[%s3843_s22 + $0x6a8] sm:$0xff]  ;;  %v260_v46 = vld [vmem:[%s3843_s22 + $0x2b0] sm:$0xff] }
  0x7b   : > { %v388_v47 = vld [vmem:[%s3843_s22 + $0x6b0] sm:$0xff] }
  0x7d   : > { %3478 = vmatmul.mubr.msk.f32.gmra.mxu0 %vm439_vm0, %v229_v48  ;;  %3670 = vmatmul.mubr.msk.f32.gmra.mxu1 %vm439_vm0, %v357_v49  ;;  %v261_v48 = vld [vmem:[%s3843_s22 + $0x2b8] sm:$0xff] }
  0x7e   : > { %3480 = vmatprep.mubr.msk.f32.mxu0 %vm439_vm0, %v230_v50  ;;  %3672 = vmatprep.mubr.msk.f32.mxu1 %vm439_vm0, %v358_v51  ;;  %v389_v49 = vld [vmem:[%s3843_s22 + $0x6b8] sm:$0xff]  ;;  %v262_v50 = vld [vmem:[%s3843_s22 + $0x2c0] sm:$0xff] }
  0x7f   : > { %v390_v51 = vld [vmem:[%s3843_s22 + $0x6c0] sm:$0xff] }
  0x81   : > { %3481 = vmatmul.mubr.msk.f32.gmra.mxu0 %vm439_vm0, %v231_v52  ;;  %3673 = vmatmul.mubr.msk.f32.gmra.mxu1 %vm439_vm0, %v359_v53  ;;  %v263_v52 = vld [vmem:[%s3843_s22 + $0x2c8] sm:$0xff] }
  0x82   : > { %3483 = vmatprep.mubr.msk.f32.mxu0 %vm439_vm0, %v232_v54  ;;  %3675 = vmatprep.mubr.msk.f32.mxu1 %vm439_vm0, %v360_v55  ;;  %v391_v53 = vld [vmem:[%s3843_s22 + $0x6c8] sm:$0xff]  ;;  %v264_v54 = vld [vmem:[%s3843_s22 + $0x2d0] sm:$0xff] }
  0x83   : > { %v392_v55 = vld [vmem:[%s3843_s22 + $0x6d0] sm:$0xff] }
  0x85   : > { %3484 = vmatmul.mubr.msk.f32.gmra.mxu0 %vm439_vm0, %v233_v56  ;;  %3676 = vmatmul.mubr.msk.f32.gmra.mxu1 %vm439_vm0, %v361_v57  ;;  %v265_v56 = vld [vmem:[%s3843_s22 + $0x2d8] sm:$0xff] }
  0x86   : > { %3486 = vmatprep.mubr.msk.f32.mxu0 %vm439_vm0, %v234_v58  ;;  %3678 = vmatprep.mubr.msk.f32.mxu1 %vm439_vm0, %v362_v59  ;;  %v393_v57 = vld [vmem:[%s3843_s22 + $0x6d8] sm:$0xff]  ;;  %v266_v58 = vld [vmem:[%s3843_s22 + $0x2e0] sm:$0xff] }
  0x87   : > { %v394_v59 = vld [vmem:[%s3843_s22 + $0x6e0] sm:$0xff] }
  0x89   : > { %3487 = vmatmul.mubr.msk.f32.gmra.mxu0 %vm439_vm0, %v235_v60  ;;  %3679 = vmatmul.mubr.msk.f32.gmra.mxu1 %vm439_vm0, %v363_v61  ;;  %v267_v60 = vld [vmem:[%s3843_s22 + $0x2e8] sm:$0xff] }
  0x8a   : > { %3489 = vmatprep.mubr.msk.f32.mxu0 %vm439_vm0, %v236_v62  ;;  %3681 = vmatprep.mubr.msk.f32.mxu1 %vm439_vm0, %v364_v63  ;;  %v395_v61 = vld [vmem:[%s3843_s22 + $0x6e8] sm:$0xff]  ;;  %v268_v62 = vld [vmem:[%s3843_s22 + $0x2f0] sm:$0xff] }
  0x8b   : > { %v396_v63 = vld [vmem:[%s3843_s22 + $0x6f0] sm:$0xff] }
  0x8d   : > { %3490 = vmatmul.mubr.msk.f32.gmra.mxu0 %vm439_vm0, %v237_v0  ;;  %3682 = vmatmul.mubr.msk.f32.gmra.mxu1 %vm439_vm0, %v365_v1  ;;  %v269_v0 = vld [vmem:[%s3843_s22 + $0x2f8] sm:$0xff] }
  0x8e   : > { %3492 = vmatprep.mubr.msk.f32.mxu0 %vm439_vm0, %v238_v2  ;;  %3684 = vmatprep.mubr.msk.f32.mxu1 %vm439_vm0, %v366_v3  ;;  %v397_v1 = vld [vmem:[%s3843_s22 + $0x6f8] sm:$0xff]  ;;  %v270_v2 = vld [vmem:[%s3843_s22 + $0x300] sm:$0xff] }
  0x8f   : > { %v398_v3 = vld [vmem:[%s3843_s22 + $0x700] sm:$0xff] }
  0x91   : > { %3493 = vmatmul.mubr.msk.f32.gmra.mxu0 %vm439_vm0, %v239_v4  ;;  %3685 = vmatmul.mubr.msk.f32.gmra.mxu1 %vm439_vm0, %v367_v5  ;;  %v271_v4 = vld [vmem:[%s3843_s22 + $0x308] sm:$0xff] }
  0x92   : > { %3495 = vmatprep.mubr.msk.f32.mxu0 %vm439_vm0, %v240_v6  ;;  %3687 = vmatprep.mubr.msk.f32.mxu1 %vm439_vm0, %v368_v7  ;;  %v399_v5 = vld [vmem:[%s3843_s22 + $0x708] sm:$0xff]  ;;  %v4238_v6 = vld [vmem:[%s5147_s2] ss:$0 sm:$0xff]  ;;  %v272_v7 = vld [vmem:[%s3843_s22 + $0x310] sm:$0xff] }
  0x95   : > { %3496 = vmatmul.mubr.msk.f32.gmra.mxu0 %vm439_vm0, %v241_v8  ;;  %3688 = vmatmul.mubr.msk.f32.gmra.mxu1 %vm439_vm0, %v369_v9  ;;  %v400_v8 = vld [vmem:[%s3843_s22 + $0x710] sm:$0xff] }
  0x96   : > { %3498 = vmatprep.mubr.msk.f32.mxu0 %vm439_vm0, %v242_v10  ;;  %3690 = vmatprep.mubr.msk.f32.mxu1 %vm439_vm0, %v370_v11 }
  0x99   : > { %3499 = vmatmul.mubr.msk.f32.gmra.mxu0 %vm439_vm0, %v243_v12  ;;  %3691 = vmatmul.mubr.msk.f32.gmra.mxu1 %vm439_vm0, %v371_v13  ;;  %v273_v13 = vld [vmem:[%s3843_s22 + $0x318] sm:$0xff] }
  0x9a   : > { %3501 = vmatprep.mubr.msk.f32.mxu0 %vm439_vm0, %v244_v14  ;;  %3693 = vmatprep.mubr.msk.f32.mxu1 %vm439_vm0, %v372_v15  ;;  %v401_v14 = vld [vmem:[%s3843_s22 + $0x718] sm:$0xff] }
  0x9d   : > { %3502 = vmatmul.mubr.msk.f32.gmra.mxu0 %vm439_vm0, %v245_v16  ;;  %3694 = vmatmul.mubr.msk.f32.gmra.mxu1 %vm439_vm0, %v373_v17  ;;  %v274_v17 = vld [vmem:[%s3843_s22 + $0x320] sm:$0xff] }
  0x9e   : > { %3504 = vmatprep.mubr.msk.f32.mxu0 %vm439_vm0, %v246_v18  ;;  %3696 = vmatprep.mubr.msk.f32.mxu1 %vm439_vm0, %v374_v19  ;;  %v402_v18 = vld [vmem:[%s3843_s22 + $0x720] sm:$0xff] }
  0xa1   : > { %3505 = vmatmul.mubr.msk.f32.gmra.mxu0 %vm439_vm0, %v247_v20  ;;  %3697 = vmatmul.mubr.msk.f32.gmra.mxu1 %vm439_vm0, %v375_v21 }
  0xa2   : > { %3507 = vmatprep.mubr.msk.f32.mxu0 %vm439_vm0, %v248_v22  ;;  %3699 = vmatprep.mubr.msk.f32.mxu1 %vm439_vm0, %v376_v23 }
  0xa5   : > { %3508 = vmatmul.mubr.msk.f32.gmra.mxu0 %vm439_vm0, %v249_v24  ;;  %3700 = vmatmul.mubr.msk.f32.gmra.mxu1 %vm439_vm0, %v377_v25  ;;  %v275_v25 = vld [vmem:[%s3843_s22 + $0x328] sm:$0xff] }
  0xa6   : > { %3510 = vmatprep.mubr.msk.f32.mxu0 %vm439_vm0, %v250_v26  ;;  %3702 = vmatprep.mubr.msk.f32.mxu1 %vm439_vm0, %v378_v27  ;;  %v403_v26 = vld [vmem:[%s3843_s22 + $0x728] sm:$0xff] }
  0xa9   : > { %3511 = vmatmul.mubr.msk.f32.gmra.mxu0 %vm439_vm0, %v251_v28  ;;  %3703 = vmatmul.mubr.msk.f32.gmra.mxu1 %vm439_vm0, %v379_v29  ;;  %v276_v29 = vld [vmem:[%s3843_s22 + $0x330] sm:$0xff] }
  0xaa   : > { %3513 = vmatprep.mubr.msk.f32.mxu0 %vm439_vm0, %v252_v30  ;;  %3705 = vmatprep.mubr.msk.f32.mxu1 %vm439_vm0, %v380_v31  ;;  %v404_v30 = vld [vmem:[%s3843_s22 + $0x730] sm:$0xff] }
  0xad   : > { %3514 = vmatmul.mubr.msk.f32.gmra.mxu0 %vm439_vm0, %v253_v32  ;;  %3706 = vmatmul.mubr.msk.f32.gmra.mxu1 %vm439_vm0, %v381_v33 }
  0xae   : > { %3516 = vmatprep.mubr.msk.f32.mxu0 %vm439_vm0, %v254_v34  ;;  %3708 = vmatprep.mubr.msk.f32.mxu1 %vm439_vm0, %v382_v35 }
  0xb1   : > { %3517 = vmatmul.mubr.msk.f32.gmra.mxu0 %vm439_vm0, %v255_v36  ;;  %3709 = vmatmul.mubr.msk.f32.gmra.mxu1 %vm439_vm0, %v383_v37  ;;  %v277_v37 = vld [vmem:[%s3843_s22 + $0x338] sm:$0xff] }
  0xb2   : > { %3519 = vmatprep.mubr.msk.f32.mxu0 %vm439_vm0, %v256_v38  ;;  %3711 = vmatprep.mubr.msk.f32.mxu1 %vm439_vm0, %v384_v39  ;;  %v405_v38 = vld [vmem:[%s3843_s22 + $0x738] sm:$0xff] }
  0xb5   : > { %3520 = vmatmul.mubr.msk.f32.gmra.mxu0 %vm439_vm0, %v257_v40  ;;  %3712 = vmatmul.mubr.msk.f32.gmra.mxu1 %vm439_vm0, %v385_v41  ;;  %v278_v41 = vld [vmem:[%s3843_s22 + $0x340] sm:$0xff] }
  0xb6   : > { %3522 = vmatprep.mubr.msk.f32.mxu0 %vm439_vm0, %v258_v42  ;;  %3714 = vmatprep.mubr.msk.f32.mxu1 %vm439_vm0, %v386_v43  ;;  %v406_v42 = vld [vmem:[%s3843_s22 + $0x740] sm:$0xff] }
  0xb9   : > { %3523 = vmatmul.mubr.msk.f32.gmra.mxu0 %vm439_vm0, %v259_v44  ;;  %3715 = vmatmul.mubr.msk.f32.gmra.mxu1 %vm439_vm0, %v387_v45 }
  0xba   : > { %3525 = vmatprep.mubr.msk.f32.mxu0 %vm439_vm0, %v260_v46  ;;  %3717 = vmatprep.mubr.msk.f32.mxu1 %vm439_vm0, %v388_v47 }
  0xbd   : > { %3526 = vmatmul.mubr.msk.f32.gmra.mxu0 %vm439_vm0, %v261_v48  ;;  %3718 = vmatmul.mubr.msk.f32.gmra.mxu1 %vm439_vm0, %v389_v49  ;;  %v279_v49 = vld [vmem:[%s3843_s22 + $0x348] sm:$0xff] }
  0xbe   : > { %3528 = vmatprep.mubr.msk.f32.mxu0 %vm439_vm0, %v262_v50  ;;  %3720 = vmatprep.mubr.msk.f32.mxu1 %vm439_vm0, %v390_v51  ;;  %v407_v50 = vld [vmem:[%s3843_s22 + $0x748] sm:$0xff] }
  0xc1   : > { %3529 = vmatmul.mubr.msk.f32.gmra.mxu0 %vm439_vm0, %v263_v52  ;;  %3721 = vmatmul.mubr.msk.f32.gmra.mxu1 %vm439_vm0, %v391_v53  ;;  %v280_v53 = vld [vmem:[%s3843_s22 + $0x350] sm:$0xff] }
  0xc2   : > { %3531 = vmatprep.mubr.msk.f32.mxu0 %vm439_vm0, %v264_v54  ;;  %3723 = vmatprep.mubr.msk.f32.mxu1 %vm439_vm0, %v392_v55  ;;  %v408_v54 = vld [vmem:[%s3843_s22 + $0x750] sm:$0xff] }
  0xc5   : > { %3532 = vmatmul.mubr.msk.f32.gmra.mxu0 %vm439_vm0, %v265_v56  ;;  %3724 = vmatmul.mubr.msk.f32.gmra.mxu1 %vm439_vm0, %v393_v57 }
  0xc6   : > { %3534 = vmatprep.mubr.msk.f32.mxu0 %vm439_vm0, %v266_v58  ;;  %3726 = vmatprep.mubr.msk.f32.mxu1 %vm439_vm0, %v394_v59 }
  0xc9   : > { %3535 = vmatmul.mubr.msk.f32.gmra.mxu0 %vm439_vm0, %v267_v60  ;;  %3727 = vmatmul.mubr.msk.f32.gmra.mxu1 %vm439_vm0, %v395_v61  ;;  %v281_v61 = vld [vmem:[%s3843_s22 + $0x358] sm:$0xff] }
  0xca   : > { %3537 = vmatprep.mubr.msk.f32.mxu0 %vm439_vm0, %v268_v62  ;;  %3729 = vmatprep.mubr.msk.f32.mxu1 %vm439_vm0, %v396_v63  ;;  %v409_v62 = vld [vmem:[%s3843_s22 + $0x758] sm:$0xff] }
  0xcd   : > { %3538 = vmatmul.mubr.msk.f32.gmra.mxu0 %vm439_vm0, %v269_v0  ;;  %3730 = vmatmul.mubr.msk.f32.gmra.mxu1 %vm439_vm0, %v397_v1  ;;  %v282_v1 = vld [vmem:[%s3843_s22 + $0x360] sm:$0xff] }
  0xce   : > { %3540 = vmatprep.mubr.msk.f32.mxu0 %vm439_vm0, %v270_v2  ;;  %3732 = vmatprep.mubr.msk.f32.mxu1 %vm439_vm0, %v398_v3  ;;  %v410_v2 = vld [vmem:[%s3843_s22 + $0x760] sm:$0xff] }
  0xd1   : > { %v3398_v9 = vpop.f32.mrf.mxu0  ;;  %3541 = vmatmul.mubr.msk.f32.gmra.mxu0 %vm439_vm0, %v271_v4  ;;  %v3590_v10 = vpop.f32.mrf.mxu1  ;;  %3733 = vmatmul.mubr.msk.f32.gmra.mxu1 %vm439_vm0, %v399_v5 }
  0xd2   : > { %v1280_v11 = vadd.f32 %v3398_v9, %v4238_v6  ;;  %v1920_v12 = vadd.f32 %v3590_v10, %v4238_v6  ;;  %3543 = vmatprep.mubr.msk.f32.mxu0 %vm439_vm0, %v272_v7  ;;  %3735 = vmatprep.mubr.msk.f32.mxu1 %vm439_vm0, %v400_v8  ;;  %v283_v10 = vld [vmem:[%s3843_s22 + $0x368] sm:$0xff] }
  0xd3   : > { %v1274_v15 = vpop.f32.mrf.mxu0  ;;  %v1914_v16 = vpop.f32.mrf.mxu1 }
  0xd4   : > { %2555 = vst.msk [vmem:[%s4247_s27 + $0x8] sm:$0xff] %vm2553_vm1, %v1280_v11  ;;  %2683 = vst.msk [vmem:[%s4247_s27 + $0x408] sm:$0xff] %vm2553_vm1, %v1920_v12  ;;  %v1275_v19 = vadd.f32 %v4238_v6, %v1274_v15  ;;  %v1915_v20 = vadd.f32 %v4238_v6, %v1914_v16  ;;  %v411_v11 = vld [vmem:[%s3843_s22 + $0x768] sm:$0xff]  ;;  %v412_v15 = vld [vmem:[%s3843_s22 + $0x770] sm:$0xff] }
  0xd5   : > { %v3401_v21 = vpop.f32.mrf.mxu0  ;;  %3544 = vmatmul.mubr.msk.f32.gmra.mxu0 %vm439_vm0, %v273_v13  ;;  %v3593_v22 = vpop.f32.mrf.mxu1  ;;  %3736 = vmatmul.mubr.msk.f32.gmra.mxu1 %vm439_vm0, %v401_v14  ;;  %v284_v14 = vld [vmem:[%s3843_s22 + $0x370] sm:$0xff] }
  0xd6   : > { %2554 = vst.msk [vmem:[%s4247_s27] sm:$0xff] %vm2553_vm1, %v1275_v19  ;;  %2682 = vst.msk [vmem:[%s4247_s27 + $0x400] sm:$0xff] %vm2553_vm1, %v1915_v20  ;;  %v1290_v23 = vadd.f32 %v3401_v21, %v4238_v6  ;;  %v1930_v24 = vadd.f32 %v3593_v22, %v4238_v6  ;;  %3546 = vmatprep.mubr.msk.f32.mxu0 %vm439_vm0, %v274_v17  ;;  %3738 = vmatprep.mubr.msk.f32.mxu1 %vm439_vm0, %v402_v18  ;;  %v285_v22 = vld [vmem:[%s3843_s22 + $0x378] sm:$0xff] }
  0xd7   : > { %v1284_v27 = vpop.f32.mrf.mxu0  ;;  %v1924_v28 = vpop.f32.mrf.mxu1 }
  0xd8   : > { %2557 = vst.msk [vmem:[%s4247_s27 + $0x18] sm:$0xff] %vm2553_vm1, %v1290_v23  ;;  %2685 = vst.msk [vmem:[%s4247_s27 + $0x418] sm:$0xff] %vm2553_vm1, %v1930_v24  ;;  %v1285_v31 = vadd.f32 %v4238_v6, %v1284_v27  ;;  %v1925_v32 = vadd.f32 %v4238_v6, %v1924_v28  ;;  %v413_v23 = vld [vmem:[%s3843_s22 + $0x778] sm:$0xff]  ;;  %v414_v27 = vld [vmem:[%s3843_s22 + $0x780] sm:$0xff] }
  0xd9   : > { %v3404_v33 = vpop.f32.mrf.mxu0  ;;  %3547 = vmatmul.mubr.msk.f32.gmra.mxu0 %vm439_vm0, %v275_v25  ;;  %v3596_v34 = vpop.f32.mrf.mxu1  ;;  %3739 = vmatmul.mubr.msk.f32.gmra.mxu1 %vm439_vm0, %v403_v26  ;;  %v286_v26 = vld [vmem:[%s3843_s22 + $0x380] sm:$0xff] }
  0xda   : > { %2556 = vst.msk [vmem:[%s4247_s27 + $0x10] sm:$0xff] %vm2553_vm1, %v1285_v31  ;;  %2684 = vst.msk [vmem:[%s4247_s27 + $0x410] sm:$0xff] %vm2553_vm1, %v1925_v32  ;;  %v1300_v35 = vadd.f32 %v3404_v33, %v4238_v6  ;;  %v1940_v36 = vadd.f32 %v3596_v34, %v4238_v6  ;;  %3549 = vmatprep.mubr.msk.f32.mxu0 %vm439_vm0, %v276_v29  ;;  %3741 = vmatprep.mubr.msk.f32.mxu1 %vm439_vm0, %v404_v30  ;;  %v287_v34 = vld [vmem:[%s3843_s22 + $0x388] sm:$0xff] }
  0xdb   : > { %v1294_v39 = vpop.f32.mrf.mxu0  ;;  %v1934_v40 = vpop.f32.mrf.mxu1 }
  0xdc   : > { %2559 = vst.msk [vmem:[%s4247_s27 + $0x28] sm:$0xff] %vm2553_vm1, %v1300_v35  ;;  %2687 = vst.msk [vmem:[%s4247_s27 + $0x428] sm:$0xff] %vm2553_vm1, %v1940_v36  ;;  %v1295_v43 = vadd.f32 %v4238_v6, %v1294_v39  ;;  %v1935_v44 = vadd.f32 %v4238_v6, %v1934_v40  ;;  %v415_v35 = vld [vmem:[%s3843_s22 + $0x788] sm:$0xff]  ;;  %v416_v39 = vld [vmem:[%s3843_s22 + $0x790] sm:$0xff] }
  0xdd   : > { %v3407_v45 = vpop.f32.mrf.mxu0  ;;  %3550 = vmatmul.mubr.msk.f32.gmra.mxu0 %vm439_vm0, %v277_v37  ;;  %v3599_v46 = vpop.f32.mrf.mxu1  ;;  %3742 = vmatmul.mubr.msk.f32.gmra.mxu1 %vm439_vm0, %v405_v38  ;;  %v288_v38 = vld [vmem:[%s3843_s22 + $0x390] sm:$0xff] }
  0xde   : > { %2558 = vst.msk [vmem:[%s4247_s27 + $0x20] sm:$0xff] %vm2553_vm1, %v1295_v43  ;;  %2686 = vst.msk [vmem:[%s4247_s27 + $0x420] sm:$0xff] %vm2553_vm1, %v1935_v44  ;;  %v1310_v47 = vadd.f32 %v3407_v45, %v4238_v6  ;;  %v1950_v48 = vadd.f32 %v3599_v46, %v4238_v6  ;;  %3552 = vmatprep.mubr.msk.f32.mxu0 %vm439_vm0, %v278_v41  ;;  %3744 = vmatprep.mubr.msk.f32.mxu1 %vm439_vm0, %v406_v42  ;;  %v289_v46 = vld [vmem:[%s3843_s22 + $0x398] sm:$0xff] }
  0xdf   : > { %v1304_v51 = vpop.f32.mrf.mxu0  ;;  %v1944_v52 = vpop.f32.mrf.mxu1 }
  0xe0   : > { %2561 = vst.msk [vmem:[%s4247_s27 + $0x38] sm:$0xff] %vm2553_vm1, %v1310_v47  ;;  %2689 = vst.msk [vmem:[%s4247_s27 + $0x438] sm:$0xff] %vm2553_vm1, %v1950_v48  ;;  %v1305_v55 = vadd.f32 %v4238_v6, %v1304_v51  ;;  %v1945_v56 = vadd.f32 %v4238_v6, %v1944_v52  ;;  %v417_v47 = vld [vmem:[%s3843_s22 + $0x798] sm:$0xff]  ;;  %v418_v51 = vld [vmem:[%s3843_s22 + $0x7a0] sm:$0xff] }
  0xe1   : > { %v3410_v57 = vpop.f32.mrf.mxu0  ;;  %3553 = vmatmul.mubr.msk.f32.gmra.mxu0 %vm439_vm0, %v279_v49  ;;  %v3602_v58 = vpop.f32.mrf.mxu1  ;;  %3745 = vmatmul.mubr.msk.f32.gmra.mxu1 %vm439_vm0, %v407_v50  ;;  %v290_v50 = vld [vmem:[%s3843_s22 + $0x3a0] sm:$0xff] }
  0xe2   : > { %2560 = vst.msk [vmem:[%s4247_s27 + $0x30] sm:$0xff] %vm2553_vm1, %v1305_v55  ;;  %2688 = vst.msk [vmem:[%s4247_s27 + $0x430] sm:$0xff] %vm2553_vm1, %v1945_v56  ;;  %v1320_v59 = vadd.f32 %v3410_v57, %v4238_v6  ;;  %v1960_v60 = vadd.f32 %v3602_v58, %v4238_v6  ;;  %3555 = vmatprep.mubr.msk.f32.mxu0 %vm439_vm0, %v280_v53  ;;  %3747 = vmatprep.mubr.msk.f32.mxu1 %vm439_vm0, %v408_v54  ;;  %v291_v58 = vld [vmem:[%s3843_s22 + $0x3a8] sm:$0xff] }
  0xe3   : > { %v1314_v63 = vpop.f32.mrf.mxu0  ;;  %v1954_v0 = vpop.f32.mrf.mxu1 }
  0xe4   : > { %2563 = vst.msk [vmem:[%s4247_s27 + $0x48] sm:$0xff] %vm2553_vm1, %v1320_v59  ;;  %2691 = vst.msk [vmem:[%s4247_s27 + $0x448] sm:$0xff] %vm2553_vm1, %v1960_v60  ;;  %v1315_v3 = vadd.f32 %v4238_v6, %v1314_v63  ;;  %v1955_v4 = vadd.f32 %v4238_v6, %v1954_v0  ;;  %v419_v59 = vld [vmem:[%s3843_s22 + $0x7a8] sm:$0xff]  ;;  %v420_v63 = vld [vmem:[%s3843_s22 + $0x7b0] sm:$0xff] }
  0xe5   : > { %v3413_v5 = vpop.f32.mrf.mxu0  ;;  %3556 = vmatmul.mubr.msk.f32.gmra.mxu0 %vm439_vm0, %v281_v61  ;;  %v3605_v7 = vpop.f32.mrf.mxu1  ;;  %3748 = vmatmul.mubr.msk.f32.gmra.mxu1 %vm439_vm0, %v409_v62  ;;  %v292_v62 = vld [vmem:[%s3843_s22 + $0x3b0] sm:$0xff] }
  0xe6   : > { %2562 = vst.msk [vmem:[%s4247_s27 + $0x40] sm:$0xff] %vm2553_vm1, %v1315_v3  ;;  %2690 = vst.msk [vmem:[%s4247_s27 + $0x440] sm:$0xff] %vm2553_vm1, %v1955_v4  ;;  %v1330_v8 = vadd.f32 %v3413_v5, %v4238_v6  ;;  %v1970_v9 = vadd.f32 %v3605_v7, %v4238_v6  ;;  %3558 = vmatprep.mubr.msk.f32.mxu0 %vm439_vm0, %v282_v1  ;;  %3750 = vmatprep.mubr.msk.f32.mxu1 %vm439_vm0, %v410_v2  ;;  %v293_v7 = vld [vmem:[%s3843_s22 + $0x3b8] sm:$0xff] }
  0xe7   : > { %v1324_v12 = vpop.f32.mrf.mxu0  ;;  %v1964_v13 = vpop.f32.mrf.mxu1 }
  0xe8   : > { %2565 = vst.msk [vmem:[%s4247_s27 + $0x58] sm:$0xff] %vm2553_vm1, %v1330_v8  ;;  %2693 = vst.msk [vmem:[%s4247_s27 + $0x458] sm:$0xff] %vm2553_vm1, %v1970_v9  ;;  %v1325_v16 = vadd.f32 %v4238_v6, %v1324_v12  ;;  %v1965_v17 = vadd.f32 %v4238_v6, %v1964_v13  ;;  %v421_v8 = vld [vmem:[%s3843_s22 + $0x7b8] sm:$0xff]  ;;  %v422_v12 = vld [vmem:[%s3843_s22 + $0x7c0] sm:$0xff] }
  0xe9   : > { %v3416_v18 = vpop.f32.mrf.mxu0  ;;  %3559 = vmatmul.mubr.msk.f32.gmra.mxu0 %vm439_vm0, %v283_v10  ;;  %v3608_v19 = vpop.f32.mrf.mxu1  ;;  %3751 = vmatmul.mubr.msk.f32.gmra.mxu1 %vm439_vm0, %v411_v11  ;;  %v294_v11 = vld [vmem:[%s3843_s22 + $0x3c0] sm:$0xff] }
  0xea   : > { %2564 = vst.msk [vmem:[%s4247_s27 + $0x50] sm:$0xff] %vm2553_vm1, %v1325_v16  ;;  %2692 = vst.msk [vmem:[%s4247_s27 + $0x450] sm:$0xff] %vm2553_vm1, %v1965_v17  ;;  %v1340_v20 = vadd.f32 %v3416_v18, %v4238_v6  ;;  %v1980_v21 = vadd.f32 %v3608_v19, %v4238_v6  ;;  %3561 = vmatprep.mubr.msk.f32.mxu0 %vm439_vm0, %v284_v14  ;;  %3753 = vmatprep.mubr.msk.f32.mxu1 %vm439_vm0, %v412_v15  ;;  %v295_v19 = vld [vmem:[%s3843_s22 + $0x3c8] sm:$0xff] }
  0xeb   : > { %v1334_v24 = vpop.f32.mrf.mxu0  ;;  %v1974_v25 = vpop.f32.mrf.mxu1 }
  0xec   : > { %2567 = vst.msk [vmem:[%s4247_s27 + $0x68] sm:$0xff] %vm2553_vm1, %v1340_v20  ;;  %2695 = vst.msk [vmem:[%s4247_s27 + $0x468] sm:$0xff] %vm2553_vm1, %v1980_v21  ;;  %v1335_v28 = vadd.f32 %v4238_v6, %v1334_v24  ;;  %v1975_v29 = vadd.f32 %v4238_v6, %v1974_v25  ;;  %v423_v20 = vld [vmem:[%s3843_s22 + $0x7c8] sm:$0xff]  ;;  %v424_v24 = vld [vmem:[%s3843_s22 + $0x7d0] sm:$0xff] }
  0xed   : > { %v3419_v30 = vpop.f32.mrf.mxu0  ;;  %3562 = vmatmul.mubr.msk.f32.gmra.mxu0 %vm439_vm0, %v285_v22  ;;  %v3611_v31 = vpop.f32.mrf.mxu1  ;;  %3754 = vmatmul.mubr.msk.f32.gmra.mxu1 %vm439_vm0, %v413_v23  ;;  %v296_v23 = vld [vmem:[%s3843_s22 + $0x3d0] sm:$0xff] }
  0xee   : > { %2566 = vst.msk [vmem:[%s4247_s27 + $0x60] sm:$0xff] %vm2553_vm1, %v1335_v28  ;;  %2694 = vst.msk [vmem:[%s4247_s27 + $0x460] sm:$0xff] %vm2553_vm1, %v1975_v29  ;;  %v1350_v32 = vadd.f32 %v3419_v30, %v4238_v6  ;;  %v1990_v33 = vadd.f32 %v3611_v31, %v4238_v6  ;;  %3564 = vmatprep.mubr.msk.f32.mxu0 %vm439_vm0, %v286_v26  ;;  %3756 = vmatprep.mubr.msk.f32.mxu1 %vm439_vm0, %v414_v27  ;;  %v297_v31 = vld [vmem:[%s3843_s22 + $0x3d8] sm:$0xff] }
  0xef   : > { %v1344_v36 = vpop.f32.mrf.mxu0  ;;  %v1984_v37 = vpop.f32.mrf.mxu1 }
  0xf0   : > { %2569 = vst.msk [vmem:[%s4247_s27 + $0x78] sm:$0xff] %vm2553_vm1, %v1350_v32  ;;  %2697 = vst.msk [vmem:[%s4247_s27 + $0x478] sm:$0xff] %vm2553_vm1, %v1990_v33  ;;  %v1345_v40 = vadd.f32 %v4238_v6, %v1344_v36  ;;  %v1985_v41 = vadd.f32 %v4238_v6, %v1984_v37  ;;  %v425_v32 = vld [vmem:[%s3843_s22 + $0x7d8] sm:$0xff]  ;;  %v426_v36 = vld [vmem:[%s3843_s22 + $0x7e0] sm:$0xff] }
  0xf1   : > { %v3422_v42 = vpop.f32.mrf.mxu0  ;;  %3565 = vmatmul.mubr.msk.f32.gmra.mxu0 %vm439_vm0, %v287_v34  ;;  %v3614_v43 = vpop.f32.mrf.mxu1  ;;  %3757 = vmatmul.mubr.msk.f32.gmra.mxu1 %vm439_vm0, %v415_v35  ;;  %v298_v35 = vld [vmem:[%s3843_s22 + $0x3e0] sm:$0xff] }
  0xf2   : > { %2568 = vst.msk [vmem:[%s4247_s27 + $0x70] sm:$0xff] %vm2553_vm1, %v1345_v40  ;;  %2696 = vst.msk [vmem:[%s4247_s27 + $0x470] sm:$0xff] %vm2553_vm1, %v1985_v41  ;;  %v1360_v44 = vadd.f32 %v3422_v42, %v4238_v6  ;;  %v2000_v45 = vadd.f32 %v3614_v43, %v4238_v6  ;;  %3567 = vmatprep.mubr.msk.f32.mxu0 %vm439_vm0, %v288_v38  ;;  %3759 = vmatprep.mubr.msk.f32.mxu1 %vm439_vm0, %v416_v39  ;;  %v299_v43 = vld [vmem:[%s3843_s22 + $0x3e8] sm:$0xff] }
  0xf3   : > { %v1354_v48 = vpop.f32.mrf.mxu0  ;;  %v1994_v49 = vpop.f32.mrf.mxu1 }
  0xf4   : > { %2571 = vst.msk [vmem:[%s4247_s27 + $0x88] sm:$0xff] %vm2553_vm1, %v1360_v44  ;;  %2699 = vst.msk [vmem:[%s4247_s27 + $0x488] sm:$0xff] %vm2553_vm1, %v2000_v45  ;;  %v1355_v52 = vadd.f32 %v4238_v6, %v1354_v48  ;;  %v1995_v53 = vadd.f32 %v4238_v6, %v1994_v49  ;;  %v427_v44 = vld [vmem:[%s3843_s22 + $0x7e8] sm:$0xff]  ;;  %v428_v48 = vld [vmem:[%s3843_s22 + $0x7f0] sm:$0xff] }
  0xf5   : > { %v3425_v54 = vpop.f32.mrf.mxu0  ;;  %3568 = vmatmul.mubr.msk.f32.gmra.mxu0 %vm439_vm0, %v289_v46  ;;  %v3617_v55 = vpop.f32.mrf.mxu1  ;;  %3760 = vmatmul.mubr.msk.f32.gmra.mxu1 %vm439_vm0, %v417_v47  ;;  %v300_v47 = vld [vmem:[%s3843_s22 + $0x3f0] sm:$0xff] }
  0xf6   : > { %2570 = vst.msk [vmem:[%s4247_s27 + $0x80] sm:$0xff] %vm2553_vm1, %v1355_v52  ;;  %2698 = vst.msk [vmem:[%s4247_s27 + $0x480] sm:$0xff] %vm2553_vm1, %v1995_v53  ;;  %v1370_v56 = vadd.f32 %v3425_v54, %v4238_v6  ;;  %v2010_v57 = vadd.f32 %v3617_v55, %v4238_v6  ;;  %3570 = vmatprep.mubr.msk.f32.mxu0 %vm439_vm0, %v290_v50  ;;  %3762 = vmatprep.mubr.msk.f32.mxu1 %vm439_vm0, %v418_v51  ;;  %v301_v55 = vld [vmem:[%s3843_s22 + $0x3f8] sm:$0xff] }
  0xf7   : > { %v1364_v60 = vpop.f32.mrf.mxu0  ;;  %v2004_v61 = vpop.f32.mrf.mxu1 }
  0xf8   : > { %2573 = vst.msk [vmem:[%s4247_s27 + $0x98] sm:$0xff] %vm2553_vm1, %v1370_v56  ;;  %2701 = vst.msk [vmem:[%s4247_s27 + $0x498] sm:$0xff] %vm2553_vm1, %v2010_v57  ;;  %v1365_v0 = vadd.f32 %v4238_v6, %v1364_v60  ;;  %v2005_v1 = vadd.f32 %v4238_v6, %v2004_v61  ;;  %v429_v56 = vld [vmem:[%s3843_s22 + $0x7f8] sm:$0xff] }
  0xf9   : > { %v3428_v2 = vpop.f32.mrf.mxu0  ;;  %3571 = vmatmul.mubr.msk.f32.gmra.mxu0 %vm439_vm0, %v291_v58  ;;  %v3620_v3 = vpop.f32.mrf.mxu1  ;;  %3763 = vmatmul.mubr.msk.f32.gmra.mxu1 %vm439_vm0, %v419_v59 }
  0xfa   : > { %2572 = vst.msk [vmem:[%s4247_s27 + $0x90] sm:$0xff] %vm2553_vm1, %v1365_v0  ;;  %2700 = vst.msk [vmem:[%s4247_s27 + $0x490] sm:$0xff] %vm2553_vm1, %v2005_v1  ;;  %v1380_v4 = vadd.f32 %v3428_v2, %v4238_v6  ;;  %v2020_v5 = vadd.f32 %v3620_v3, %v4238_v6  ;;  %3573 = vmatprep.mubr.msk.f32.mxu0 %vm439_vm0, %v292_v62  ;;  %3765 = vmatprep.mubr.msk.f32.mxu1 %vm439_vm0, %v420_v63 }
  0xfb   : > { %v1374_v9 = vpop.f32.mrf.mxu0  ;;  %v2014_v10 = vpop.f32.mrf.mxu1 }
  0xfc   : > { %2575 = vst.msk [vmem:[%s4247_s27 + $0xa8] sm:$0xff] %vm2553_vm1, %v1380_v4  ;;  %2703 = vst.msk [vmem:[%s4247_s27 + $0x4a8] sm:$0xff] %vm2553_vm1, %v2020_v5  ;;  %v1375_v13 = vadd.f32 %v4238_v6, %v1374_v9  ;;  %v2015_v14 = vadd.f32 %v4238_v6, %v2014_v10 }
  0xfd   : > { %v3431_v15 = vpop.f32.mrf.mxu0  ;;  %3574 = vmatmul.mubr.msk.f32.gmra.mxu0 %vm439_vm0, %v293_v7  ;;  %v3623_v16 = vpop.f32.mrf.mxu1  ;;  %3766 = vmatmul.mubr.msk.f32.gmra.mxu1 %vm439_vm0, %v421_v8 }
  0xfe   : > { %2574 = vst.msk [vmem:[%s4247_s27 + $0xa0] sm:$0xff] %vm2553_vm1, %v1375_v13  ;;  %2702 = vst.msk [vmem:[%s4247_s27 + $0x4a0] sm:$0xff] %vm2553_vm1, %v2015_v14  ;;  %v1390_v17 = vadd.f32 %v3431_v15, %v4238_v6  ;;  %v2030_v18 = vadd.f32 %v3623_v16, %v4238_v6  ;;  %3576 = vmatprep.mubr.msk.f32.mxu0 %vm439_vm0, %v294_v11  ;;  %3768 = vmatprep.mubr.msk.f32.mxu1 %vm439_vm0, %v422_v12 }
  0xff   : > { %v1384_v21 = vpop.f32.mrf.mxu0  ;;  %v2024_v22 = vpop.f32.mrf.mxu1 }
 0x100   : > { %2577 = vst.msk [vmem:[%s4247_s27 + $0xb8] sm:$0xff] %vm2553_vm1, %v1390_v17  ;;  %2705 = vst.msk [vmem:[%s4247_s27 + $0x4b8] sm:$0xff] %vm2553_vm1, %v2030_v18  ;;  %v1385_v25 = vadd.f32 %v4238_v6, %v1384_v21  ;;  %v2025_v26 = vadd.f32 %v4238_v6, %v2024_v22 }
 0x101   : > { %v3434_v27 = vpop.f32.mrf.mxu0  ;;  %3577 = vmatmul.mubr.msk.f32.gmra.mxu0 %vm439_vm0, %v295_v19  ;;  %v3626_v28 = vpop.f32.mrf.mxu1  ;;  %3769 = vmatmul.mubr.msk.f32.gmra.mxu1 %vm439_vm0, %v423_v20 }
 0x102   : > { %2576 = vst.msk [vmem:[%s4247_s27 + $0xb0] sm:$0xff] %vm2553_vm1, %v1385_v25  ;;  %2704 = vst.msk [vmem:[%s4247_s27 + $0x4b0] sm:$0xff] %vm2553_vm1, %v2025_v26  ;;  %v1400_v29 = vadd.f32 %v3434_v27, %v4238_v6  ;;  %v2040_v30 = vadd.f32 %v3626_v28, %v4238_v6  ;;  %3579 = vmatprep.mubr.msk.f32.mxu0 %vm439_vm0, %v296_v23  ;;  %3771 = vmatprep.mubr.msk.f32.mxu1 %vm439_vm0, %v424_v24 }
 0x103   : > { %v1394_v33 = vpop.f32.mrf.mxu0  ;;  %v2034_v34 = vpop.f32.mrf.mxu1 }
 0x104   : > { %2579 = vst.msk [vmem:[%s4247_s27 + $0xc8] sm:$0xff] %vm2553_vm1, %v1400_v29  ;;  %2707 = vst.msk [vmem:[%s4247_s27 + $0x4c8] sm:$0xff] %vm2553_vm1, %v2040_v30  ;;  %v1395_v37 = vadd.f32 %v4238_v6, %v1394_v33  ;;  %v2035_v38 = vadd.f32 %v4238_v6, %v2034_v34 }
 0x105   : > { %v3437_v39 = vpop.f32.mrf.mxu0  ;;  %3580 = vmatmul.mubr.msk.f32.gmra.mxu0 %vm439_vm0, %v297_v31  ;;  %v3629_v40 = vpop.f32.mrf.mxu1  ;;  %3772 = vmatmul.mubr.msk.f32.gmra.mxu1 %vm439_vm0, %v425_v32 }
 0x106   : > { %2578 = vst.msk [vmem:[%s4247_s27 + $0xc0] sm:$0xff] %vm2553_vm1, %v1395_v37  ;;  %2706 = vst.msk [vmem:[%s4247_s27 + $0x4c0] sm:$0xff] %vm2553_vm1, %v2035_v38  ;;  %v1410_v41 = vadd.f32 %v3437_v39, %v4238_v6  ;;  %v2050_v42 = vadd.f32 %v3629_v40, %v4238_v6  ;;  %3582 = vmatprep.mubr.msk.f32.mxu0 %vm439_vm0, %v298_v35  ;;  %3774 = vmatprep.mubr.msk.f32.mxu1 %vm439_vm0, %v426_v36 }
 0x107   : > { %v1404_v45 = vpop.f32.mrf.mxu0  ;;  %v2044_v46 = vpop.f32.mrf.mxu1 }
 0x108   : > { %2581 = vst.msk [vmem:[%s4247_s27 + $0xd8] sm:$0xff] %vm2553_vm1, %v1410_v41  ;;  %2709 = vst.msk [vmem:[%s4247_s27 + $0x4d8] sm:$0xff] %vm2553_vm1, %v2050_v42  ;;  %v1405_v49 = vadd.f32 %v4238_v6, %v1404_v45  ;;  %v2045_v50 = vadd.f32 %v4238_v6, %v2044_v46 }
 0x109   : > { %v3440_v51 = vpop.f32.mrf.mxu0  ;;  %3583 = vmatmul.mubr.msk.f32.gmra.mxu0 %vm439_vm0, %v299_v43  ;;  %v3632_v52 = vpop.f32.mrf.mxu1  ;;  %3775 = vmatmul.mubr.msk.f32.gmra.mxu1 %vm439_vm0, %v427_v44 }
 0x10a   : > { %2580 = vst.msk [vmem:[%s4247_s27 + $0xd0] sm:$0xff] %vm2553_vm1, %v1405_v49  ;;  %2708 = vst.msk [vmem:[%s4247_s27 + $0x4d0] sm:$0xff] %vm2553_vm1, %v2045_v50  ;;  %v1420_v53 = vadd.f32 %v3440_v51, %v4238_v6  ;;  %v2060_v54 = vadd.f32 %v3632_v52, %v4238_v6  ;;  %3585 = vmatprep.mubr.msk.f32.mxu0 %vm439_vm0, %v300_v47  ;;  %3777 = vmatprep.mubr.msk.f32.mxu1 %vm439_vm0, %v428_v48 }
 0x10b   : > { %v1414_v57 = vpop.f32.mrf.mxu0  ;;  %v2054_v58 = vpop.f32.mrf.mxu1 }
 0x10c   : > { %2583 = vst.msk [vmem:[%s4247_s27 + $0xe8] sm:$0xff] %vm2553_vm1, %v1420_v53  ;;  %2711 = vst.msk [vmem:[%s4247_s27 + $0x4e8] sm:$0xff] %vm2553_vm1, %v2060_v54  ;;  %v1415_v59 = vadd.f32 %v4238_v6, %v1414_v57  ;;  %v2055_v60 = vadd.f32 %v4238_v6, %v2054_v58 }
 0x10d   : > { %v3443_v61 = vpop.f32.mrf.mxu0  ;;  %3586 = vmatmul.mubr.msk.f32.gmra.mxu0 %vm439_vm0, %v301_v55  ;;  %v3635_v62 = vpop.f32.mrf.mxu1  ;;  %3778 = vmatmul.mubr.msk.f32.gmra.mxu1 %vm439_vm0, %v429_v56 }
 0x10e   : > { %2582 = vst.msk [vmem:[%s4247_s27 + $0xe0] sm:$0xff] %vm2553_vm1, %v1415_v59  ;;  %2710 = vst.msk [vmem:[%s4247_s27 + $0x4e0] sm:$0xff] %vm2553_vm1, %v2055_v60  ;;  %v1430_v63 = vadd.f32 %v3443_v61, %v4238_v6  ;;  %v2070_v0 = vadd.f32 %v3635_v62, %v4238_v6 }
 0x10f   : > { %v1424_v1 = vpop.f32.mrf.mxu0  ;;  %v2064_v2 = vpop.f32.mrf.mxu1 }
 0x110   : > { %2585 = vst.msk [vmem:[%s4247_s27 + $0xf8] sm:$0xff] %vm2553_vm1, %v1430_v63  ;;  %2713 = vst.msk [vmem:[%s4247_s27 + $0x4f8] sm:$0xff] %vm2553_vm1, %v2070_v0  ;;  %v1425_v3 = vadd.f32 %v4238_v6, %v1424_v1  ;;  %v2065_v4 = vadd.f32 %v4238_v6, %v2064_v2 }
 0x111   : > { %v3446_v5 = vpop.f32.mrf.mxu0  ;;  %v3638_v7 = vpop.f32.mrf.mxu1 }
 0x112   : > { %2584 = vst.msk [vmem:[%s4247_s27 + $0xf0] sm:$0xff] %vm2553_vm1, %v1425_v3  ;;  %2712 = vst.msk [vmem:[%s4247_s27 + $0x4f0] sm:$0xff] %vm2553_vm1, %v2065_v4  ;;  %v1440_v8 = vadd.f32 %v3446_v5, %v4238_v6  ;;  %v2080_v9 = vadd.f32 %v3638_v7, %v4238_v6 }
 0x113   : > { %v1434_v10 = vpop.f32.mrf.mxu0  ;;  %v2074_v11 = vpop.f32.mrf.mxu1 }
 0x114   : > { %2587 = vst.msk [vmem:[%s4247_s27 + $0x108] sm:$0xff] %vm2553_vm1, %v1440_v8  ;;  %2715 = vst.msk [vmem:[%s4247_s27 + $0x508] sm:$0xff] %vm2553_vm1, %v2080_v9  ;;  %v1435_v12 = vadd.f32 %v4238_v6, %v1434_v10  ;;  %v2075_v13 = vadd.f32 %v4238_v6, %v2074_v11 }
 0x115   : > { %v3449_v14 = vpop.f32.mrf.mxu0  ;;  %v3641_v15 = vpop.f32.mrf.mxu1 }
 0x116   : > { %2586 = vst.msk [vmem:[%s4247_s27 + $0x100] sm:$0xff] %vm2553_vm1, %v1435_v12  ;;  %2714 = vst.msk [vmem:[%s4247_s27 + $0x500] sm:$0xff] %vm2553_vm1, %v2075_v13  ;;  %v1450_v16 = vadd.f32 %v3449_v14, %v4238_v6  ;;  %v2090_v17 = vadd.f32 %v3641_v15, %v4238_v6 }
 0x117   : > { %v1444_v18 = vpop.f32.mrf.mxu0  ;;  %v2084_v19 = vpop.f32.mrf.mxu1 }
 0x118   : > { %2589 = vst.msk [vmem:[%s4247_s27 + $0x118] sm:$0xff] %vm2553_vm1, %v1450_v16  ;;  %2717 = vst.msk [vmem:[%s4247_s27 + $0x518] sm:$0xff] %vm2553_vm1, %v2090_v17  ;;  %v1445_v20 = vadd.f32 %v4238_v6, %v1444_v18  ;;  %v2085_v21 = vadd.f32 %v4238_v6, %v2084_v19 }
 0x119   : > { %v3452_v22 = vpop.f32.mrf.mxu0  ;;  %v3644_v23 = vpop.f32.mrf.mxu1 }
 0x11a   : > { %2588 = vst.msk [vmem:[%s4247_s27 + $0x110] sm:$0xff] %vm2553_vm1, %v1445_v20  ;;  %2716 = vst.msk [vmem:[%s4247_s27 + $0x510] sm:$0xff] %vm2553_vm1, %v2085_v21  ;;  %v1460_v24 = vadd.f32 %v3452_v22, %v4238_v6  ;;  %v2100_v25 = vadd.f32 %v3644_v23, %v4238_v6 }
 0x11b   : > { %v1454_v26 = vpop.f32.mrf.mxu0  ;;  %v2094_v27 = vpop.f32.mrf.mxu1 }
 0x11c   : > { %2591 = vst.msk [vmem:[%s4247_s27 + $0x128] sm:$0xff] %vm2553_vm1, %v1460_v24  ;;  %2719 = vst.msk [vmem:[%s4247_s27 + $0x528] sm:$0xff] %vm2553_vm1, %v2100_v25  ;;  %v1455_v28 = vadd.f32 %v4238_v6, %v1454_v26  ;;  %v2095_v29 = vadd.f32 %v4238_v6, %v2094_v27 }
 0x11d   : > { %v3455_v30 = vpop.f32.mrf.mxu0  ;;  %v3647_v31 = vpop.f32.mrf.mxu1 }
 0x11e   : > { %2590 = vst.msk [vmem:[%s4247_s27 + $0x120] sm:$0xff] %vm2553_vm1, %v1455_v28  ;;  %2718 = vst.msk [vmem:[%s4247_s27 + $0x520] sm:$0xff] %vm2553_vm1, %v2095_v29  ;;  %v1470_v32 = vadd.f32 %v3455_v30, %v4238_v6  ;;  %v2110_v33 = vadd.f32 %v3647_v31, %v4238_v6 }
 0x11f   : > { %v1464_v34 = vpop.f32.mrf.mxu0  ;;  %v2104_v35 = vpop.f32.mrf.mxu1 }
 0x120   : > { %2593 = vst.msk [vmem:[%s4247_s27 + $0x138] sm:$0xff] %vm2553_vm1, %v1470_v32  ;;  %2721 = vst.msk [vmem:[%s4247_s27 + $0x538] sm:$0xff] %vm2553_vm1, %v2110_v33  ;;  %v1465_v36 = vadd.f32 %v4238_v6, %v1464_v34  ;;  %v2105_v37 = vadd.f32 %v4238_v6, %v2104_v35 }
 0x121   : > { %v3458_v38 = vpop.f32.mrf.mxu0  ;;  %v3650_v39 = vpop.f32.mrf.mxu1 }
 0x122   : > { %2592 = vst.msk [vmem:[%s4247_s27 + $0x130] sm:$0xff] %vm2553_vm1, %v1465_v36  ;;  %2720 = vst.msk [vmem:[%s4247_s27 + $0x530] sm:$0xff] %vm2553_vm1, %v2105_v37  ;;  %v1480_v40 = vadd.f32 %v3458_v38, %v4238_v6  ;;  %v2120_v41 = vadd.f32 %v3650_v39, %v4238_v6 }
 0x123   : > { %v1474_v42 = vpop.f32.mrf.mxu0  ;;  %v2114_v43 = vpop.f32.mrf.mxu1 }
 0x124   : > { %2595 = vst.msk [vmem:[%s4247_s27 + $0x148] sm:$0xff] %vm2553_vm1, %v1480_v40  ;;  %2723 = vst.msk [vmem:[%s4247_s27 + $0x548] sm:$0xff] %vm2553_vm1, %v2120_v41  ;;  %v1475_v44 = vadd.f32 %v4238_v6, %v1474_v42  ;;  %v2115_v45 = vadd.f32 %v4238_v6, %v2114_v43 }
 0x125   : > { %v3461_v46 = vpop.f32.mrf.mxu0  ;;  %v3653_v47 = vpop.f32.mrf.mxu1 }
 0x126   : > { %2594 = vst.msk [vmem:[%s4247_s27 + $0x140] sm:$0xff] %vm2553_vm1, %v1475_v44  ;;  %2722 = vst.msk [vmem:[%s4247_s27 + $0x540] sm:$0xff] %vm2553_vm1, %v2115_v45  ;;  %v1490_v48 = vadd.f32 %v3461_v46, %v4238_v6  ;;  %v2130_v49 = vadd.f32 %v3653_v47, %v4238_v6 }
 0x127   : > { %v1484_v50 = vpop.f32.mrf.mxu0  ;;  %v2124_v51 = vpop.f32.mrf.mxu1 }
 0x128   : > { %2597 = vst.msk [vmem:[%s4247_s27 + $0x158] sm:$0xff] %vm2553_vm1, %v1490_v48  ;;  %2725 = vst.msk [vmem:[%s4247_s27 + $0x558] sm:$0xff] %vm2553_vm1, %v2130_v49  ;;  %v1485_v52 = vadd.f32 %v4238_v6, %v1484_v50  ;;  %v2125_v53 = vadd.f32 %v4238_v6, %v2124_v51 }
 0x129   : > { %v3464_v54 = vpop.f32.mrf.mxu0  ;;  %v3656_v55 = vpop.f32.mrf.mxu1 }
 0x12a   : > { %2596 = vst.msk [vmem:[%s4247_s27 + $0x150] sm:$0xff] %vm2553_vm1, %v1485_v52  ;;  %2724 = vst.msk [vmem:[%s4247_s27 + $0x550] sm:$0xff] %vm2553_vm1, %v2125_v53  ;;  %v1500_v56 = vadd.f32 %v3464_v54, %v4238_v6  ;;  %v2140_v57 = vadd.f32 %v3656_v55, %v4238_v6 }
 0x12b   : > { %v1494_v58 = vpop.f32.mrf.mxu0  ;;  %v2134_v59 = vpop.f32.mrf.mxu1 }
 0x12c   : > { %2599 = vst.msk [vmem:[%s4247_s27 + $0x168] sm:$0xff] %vm2553_vm1, %v1500_v56  ;;  %2727 = vst.msk [vmem:[%s4247_s27 + $0x568] sm:$0xff] %vm2553_vm1, %v2140_v57  ;;  %v1495_v60 = vadd.f32 %v4238_v6, %v1494_v58  ;;  %v2135_v61 = vadd.f32 %v4238_v6, %v2134_v59 }
 0x12d   : > { %v3467_v62 = vpop.f32.mrf.mxu0  ;;  %v3659_v63 = vpop.f32.mrf.mxu1 }
 0x12e   : > { %2598 = vst.msk [vmem:[%s4247_s27 + $0x160] sm:$0xff] %vm2553_vm1, %v1495_v60  ;;  %2726 = vst.msk [vmem:[%s4247_s27 + $0x560] sm:$0xff] %vm2553_vm1, %v2135_v61  ;;  %v1510_v0 = vadd.f32 %v3467_v62, %v4238_v6  ;;  %v2150_v1 = vadd.f32 %v3659_v63, %v4238_v6 }
 0x12f   : > { %v1504_v2 = vpop.f32.mrf.mxu0  ;;  %v2144_v3 = vpop.f32.mrf.mxu1 }
 0x130   : > { %2601 = vst.msk [vmem:[%s4247_s27 + $0x178] sm:$0xff] %vm2553_vm1, %v1510_v0  ;;  %2729 = vst.msk [vmem:[%s4247_s27 + $0x578] sm:$0xff] %vm2553_vm1, %v2150_v1  ;;  %v1505_v4 = vadd.f32 %v4238_v6, %v1504_v2  ;;  %v2145_v5 = vadd.f32 %v4238_v6, %v2144_v3 }
 0x131   : > { %v3470_v7 = vpop.f32.mrf.mxu0  ;;  %v3662_v8 = vpop.f32.mrf.mxu1 }
 0x132   : > { %2600 = vst.msk [vmem:[%s4247_s27 + $0x170] sm:$0xff] %vm2553_vm1, %v1505_v4  ;;  %2728 = vst.msk [vmem:[%s4247_s27 + $0x570] sm:$0xff] %vm2553_vm1, %v2145_v5  ;;  %v1520_v9 = vadd.f32 %v3470_v7, %v4238_v6  ;;  %v2160_v10 = vadd.f32 %v3662_v8, %v4238_v6 }
 0x133   : > { %v1514_v11 = vpop.f32.mrf.mxu0  ;;  %v2154_v12 = vpop.f32.mrf.mxu1 }
 0x134   : > { %2603 = vst.msk [vmem:[%s4247_s27 + $0x188] sm:$0xff] %vm2553_vm1, %v1520_v9  ;;  %2731 = vst.msk [vmem:[%s4247_s27 + $0x588] sm:$0xff] %vm2553_vm1, %v2160_v10  ;;  %v1515_v13 = vadd.f32 %v4238_v6, %v1514_v11  ;;  %v2155_v14 = vadd.f32 %v4238_v6, %v2154_v12  ;;  %v4757_v11 = vld [vmem:[%s5147_s2] ss:$0 sm:$0xff] }
 0x135   : > { %v3473_v15 = vpop.f32.mrf.mxu0  ;;  %v3665_v16 = vpop.f32.mrf.mxu1 }
 0x136   : > { %2602 = vst.msk [vmem:[%s4247_s27 + $0x180] sm:$0xff] %vm2553_vm1, %v1515_v13  ;;  %2730 = vst.msk [vmem:[%s4247_s27 + $0x580] sm:$0xff] %vm2553_vm1, %v2155_v14  ;;  %v1530_v17 = vadd.f32 %v3473_v15, %v4238_v6  ;;  %v2170_v18 = vadd.f32 %v3665_v16, %v4238_v6 }
 0x137   : > { %v1524_v19 = vpop.f32.mrf.mxu0  ;;  %v2164_v20 = vpop.f32.mrf.mxu1 }
 0x138   : > { %2605 = vst.msk [vmem:[%s4247_s27 + $0x198] sm:$0xff] %vm2553_vm1, %v1530_v17  ;;  %2733 = vst.msk [vmem:[%s4247_s27 + $0x598] sm:$0xff] %vm2553_vm1, %v2170_v18  ;;  %v1525_v21 = vadd.f32 %v4238_v6, %v1524_v19  ;;  %v2165_v22 = vadd.f32 %v4238_v6, %v2164_v20 }
 0x139   : > { %v3476_v23 = vpop.f32.mrf.mxu0  ;;  %v3668_v24 = vpop.f32.mrf.mxu1 }
 0x13a   : > { %2604 = vst.msk [vmem:[%s4247_s27 + $0x190] sm:$0xff] %vm2553_vm1, %v1525_v21  ;;  %2732 = vst.msk [vmem:[%s4247_s27 + $0x590] sm:$0xff] %vm2553_vm1, %v2165_v22  ;;  %v1540_v25 = vadd.f32 %v3476_v23, %v4238_v6  ;;  %v2180_v26 = vadd.f32 %v3668_v24, %v4238_v6 }
 0x13b   : > { %v1534_v27 = vpop.f32.mrf.mxu0  ;;  %v2174_v28 = vpop.f32.mrf.mxu1 }
 0x13c   : > { %2607 = vst.msk [vmem:[%s4247_s27 + $0x1a8] sm:$0xff] %vm2553_vm1, %v1540_v25  ;;  %2735 = vst.msk [vmem:[%s4247_s27 + $0x5a8] sm:$0xff] %vm2553_vm1, %v2180_v26  ;;  %v1535_v29 = vadd.f32 %v4238_v6, %v1534_v27  ;;  %v2175_v30 = vadd.f32 %v4238_v6, %v2174_v28 }
 0x13d   : > { %v3479_v31 = vpop.f32.mrf.mxu0  ;;  %v3671_v32 = vpop.f32.mrf.mxu1 }
 0x13e   : > { %2606 = vst.msk [vmem:[%s4247_s27 + $0x1a0] sm:$0xff] %vm2553_vm1, %v1535_v29  ;;  %2734 = vst.msk [vmem:[%s4247_s27 + $0x5a0] sm:$0xff] %vm2553_vm1, %v2175_v30  ;;  %v1550_v33 = vadd.f32 %v3479_v31, %v4238_v6  ;;  %v2190_v34 = vadd.f32 %v3671_v32, %v4238_v6 }
 0x13f   : > { %v1544_v35 = vpop.f32.mrf.mxu0  ;;  %v2184_v36 = vpop.f32.mrf.mxu1 }
 0x140   : > { %2609 = vst.msk [vmem:[%s4247_s27 + $0x1b8] sm:$0xff] %vm2553_vm1, %v1550_v33  ;;  %2737 = vst.msk [vmem:[%s4247_s27 + $0x5b8] sm:$0xff] %vm2553_vm1, %v2190_v34  ;;  %v1545_v37 = vadd.f32 %v4238_v6, %v1544_v35  ;;  %v2185_v38 = vadd.f32 %v4238_v6, %v2184_v36 }
 0x141   : > { %v3482_v39 = vpop.f32.mrf.mxu0  ;;  %v3674_v40 = vpop.f32.mrf.mxu1 }
 0x142   : > { %2608 = vst.msk [vmem:[%s4247_s27 + $0x1b0] sm:$0xff] %vm2553_vm1, %v1545_v37  ;;  %2736 = vst.msk [vmem:[%s4247_s27 + $0x5b0] sm:$0xff] %vm2553_vm1, %v2185_v38  ;;  %v1560_v41 = vadd.f32 %v3482_v39, %v4238_v6  ;;  %v2200_v42 = vadd.f32 %v3674_v40, %v4238_v6 }
 0x143   : > { %v1554_v43 = vpop.f32.mrf.mxu0  ;;  %v2194_v44 = vpop.f32.mrf.mxu1 }
 0x144   : > { %2611 = vst.msk [vmem:[%s4247_s27 + $0x1c8] sm:$0xff] %vm2553_vm1, %v1560_v41  ;;  %2739 = vst.msk [vmem:[%s4247_s27 + $0x5c8] sm:$0xff] %vm2553_vm1, %v2200_v42  ;;  %v1555_v45 = vadd.f32 %v4238_v6, %v1554_v43  ;;  %v2195_v46 = vadd.f32 %v4238_v6, %v2194_v44 }
 0x145   : > { %v3485_v47 = vpop.f32.mrf.mxu0  ;;  %v3677_v48 = vpop.f32.mrf.mxu1 }
 0x146   : > { %2610 = vst.msk [vmem:[%s4247_s27 + $0x1c0] sm:$0xff] %vm2553_vm1, %v1555_v45  ;;  %2738 = vst.msk [vmem:[%s4247_s27 + $0x5c0] sm:$0xff] %vm2553_vm1, %v2195_v46  ;;  %v1570_v49 = vadd.f32 %v3485_v47, %v4238_v6  ;;  %v2210_v50 = vadd.f32 %v3677_v48, %v4238_v6 }
 0x147   : > { %v1564_v51 = vpop.f32.mrf.mxu0  ;;  %v2204_v52 = vpop.f32.mrf.mxu1 }
 0x148   : > { %2613 = vst.msk [vmem:[%s4247_s27 + $0x1d8] sm:$0xff] %vm2553_vm1, %v1570_v49  ;;  %2741 = vst.msk [vmem:[%s4247_s27 + $0x5d8] sm:$0xff] %vm2553_vm1, %v2210_v50  ;;  %v1565_v53 = vadd.f32 %v4238_v6, %v1564_v51  ;;  %v2205_v54 = vadd.f32 %v4238_v6, %v2204_v52 }
 0x149   : > { %v3488_v55 = vpop.f32.mrf.mxu0  ;;  %v3680_v56 = vpop.f32.mrf.mxu1 }
 0x14a   : > { %2612 = vst.msk [vmem:[%s4247_s27 + $0x1d0] sm:$0xff] %vm2553_vm1, %v1565_v53  ;;  %2740 = vst.msk [vmem:[%s4247_s27 + $0x5d0] sm:$0xff] %vm2553_vm1, %v2205_v54  ;;  %v1580_v57 = vadd.f32 %v3488_v55, %v4238_v6  ;;  %v2220_v58 = vadd.f32 %v3680_v56, %v4238_v6 }
 0x14b   : > { %v1574_v59 = vpop.f32.mrf.mxu0  ;;  %v2214_v60 = vpop.f32.mrf.mxu1 }
 0x14c   : > { %2615 = vst.msk [vmem:[%s4247_s27 + $0x1e8] sm:$0xff] %vm2553_vm1, %v1580_v57  ;;  %2743 = vst.msk [vmem:[%s4247_s27 + $0x5e8] sm:$0xff] %vm2553_vm1, %v2220_v58  ;;  %v1575_v61 = vadd.f32 %v4238_v6, %v1574_v59  ;;  %v2215_v62 = vadd.f32 %v4238_v6, %v2214_v60 }
 0x14d   : > { %v3491_v63 = vpop.f32.mrf.mxu0  ;;  %v3683_v0 = vpop.f32.mrf.mxu1 }
 0x14e   : > { %2614 = vst.msk [vmem:[%s4247_s27 + $0x1e0] sm:$0xff] %vm2553_vm1, %v1575_v61  ;;  %2742 = vst.msk [vmem:[%s4247_s27 + $0x5e0] sm:$0xff] %vm2553_vm1, %v2215_v62  ;;  %v1590_v1 = vadd.f32 %v3491_v63, %v4238_v6  ;;  %v2230_v2 = vadd.f32 %v3683_v0, %v4238_v6 }
 0x14f   : > { %v1584_v3 = vpop.f32.mrf.mxu0  ;;  %v2224_v4 = vpop.f32.mrf.mxu1 }
 0x150   : > { %2617 = vst.msk [vmem:[%s4247_s27 + $0x1f8] sm:$0xff] %vm2553_vm1, %v1590_v1  ;;  %2745 = vst.msk [vmem:[%s4247_s27 + $0x5f8] sm:$0xff] %vm2553_vm1, %v2230_v2  ;;  %v1585_v5 = vadd.f32 %v4238_v6, %v1584_v3  ;;  %v2225_v7 = vadd.f32 %v4238_v6, %v2224_v4 }
 0x151   : > { %v3494_v8 = vpop.f32.mrf.mxu0  ;;  %v3686_v9 = vpop.f32.mrf.mxu1 }
 0x152   : > { %2616 = vst.msk [vmem:[%s4247_s27 + $0x1f0] sm:$0xff] %vm2553_vm1, %v1585_v5  ;;  %2744 = vst.msk [vmem:[%s4247_s27 + $0x5f0] sm:$0xff] %vm2553_vm1, %v2225_v7  ;;  %v1600_v10 = vadd.f32 %v3494_v8, %v4238_v6  ;;  %v2240_v12 = vadd.f32 %v4757_v11, %v3686_v9 }
 0x153   : > { %v1594_v13 = vpop.f32.mrf.mxu0  ;;  %v2234_v14 = vpop.f32.mrf.mxu1 }
 0x154   : > { %2619 = vst.msk [vmem:[%s4247_s27 + $0x208] sm:$0xff] %vm2553_vm1, %v1600_v10  ;;  %2747 = vst.msk [vmem:[%s4247_s27 + $0x608] sm:$0xff] %vm2553_vm1, %v2240_v12  ;;  %v1595_v15 = vadd.f32 %v4757_v11, %v1594_v13  ;;  %v2235_v6 = vadd.f32 %v4757_v11, %v2234_v14 }
 0x155   : > { %v3497_v16 = vpop.f32.mrf.mxu0  ;;  %v3689_v17 = vpop.f32.mrf.mxu1 }
 0x156   : > { %2618 = vst.msk [vmem:[%s4247_s27 + $0x200] sm:$0xff] %vm2553_vm1, %v1595_v15  ;;  %2746 = vst.msk [vmem:[%s4247_s27 + $0x600] sm:$0xff] %vm2553_vm1, %v2235_v6  ;;  %v1610_v18 = vadd.f32 %v4757_v11, %v3497_v16  ;;  %v2250_v19 = vadd.f32 %v4757_v11, %v3689_v17 }
 0x157   : > { %v1604_v20 = vpop.f32.mrf.mxu0  ;;  %v2244_v21 = vpop.f32.mrf.mxu1 }
 0x158   : > { %2621 = vst.msk [vmem:[%s4247_s27 + $0x218] sm:$0xff] %vm2553_vm1, %v1610_v18  ;;  %2749 = vst.msk [vmem:[%s4247_s27 + $0x618] sm:$0xff] %vm2553_vm1, %v2250_v19  ;;  %v1605_v22 = vadd.f32 %v4757_v11, %v1604_v20  ;;  %v2245_v23 = vadd.f32 %v4757_v11, %v2244_v21 }
 0x159   : > { %v3500_v24 = vpop.f32.mrf.mxu0  ;;  %v3692_v25 = vpop.f32.mrf.mxu1 }
 0x15a   : > { %2620 = vst.msk [vmem:[%s4247_s27 + $0x210] sm:$0xff] %vm2553_vm1, %v1605_v22  ;;  %2748 = vst.msk [vmem:[%s4247_s27 + $0x610] sm:$0xff] %vm2553_vm1, %v2245_v23  ;;  %v1620_v26 = vadd.f32 %v4757_v11, %v3500_v24  ;;  %v2260_v27 = vadd.f32 %v4757_v11, %v3692_v25 }
 0x15b   : > { %v1614_v28 = vpop.f32.mrf.mxu0  ;;  %v2254_v29 = vpop.f32.mrf.mxu1 }
 0x15c   : > { %2623 = vst.msk [vmem:[%s4247_s27 + $0x228] sm:$0xff] %vm2553_vm1, %v1620_v26  ;;  %2751 = vst.msk [vmem:[%s4247_s27 + $0x628] sm:$0xff] %vm2553_vm1, %v2260_v27  ;;  %v1615_v30 = vadd.f32 %v4757_v11, %v1614_v28  ;;  %v2255_v31 = vadd.f32 %v4757_v11, %v2254_v29 }
 0x15d   : > { %v3503_v32 = vpop.f32.mrf.mxu0  ;;  %v3695_v33 = vpop.f32.mrf.mxu1 }
 0x15e   : > { %2622 = vst.msk [vmem:[%s4247_s27 + $0x220] sm:$0xff] %vm2553_vm1, %v1615_v30  ;;  %2750 = vst.msk [vmem:[%s4247_s27 + $0x620] sm:$0xff] %vm2553_vm1, %v2255_v31  ;;  %v1630_v34 = vadd.f32 %v4757_v11, %v3503_v32  ;;  %v2270_v35 = vadd.f32 %v4757_v11, %v3695_v33 }
 0x15f   : > { %v1624_v36 = vpop.f32.mrf.mxu0  ;;  %v2264_v37 = vpop.f32.mrf.mxu1 }
 0x160   : > { %2625 = vst.msk [vmem:[%s4247_s27 + $0x238] sm:$0xff] %vm2553_vm1, %v1630_v34  ;;  %2753 = vst.msk [vmem:[%s4247_s27 + $0x638] sm:$0xff] %vm2553_vm1, %v2270_v35  ;;  %v1625_v38 = vadd.f32 %v4757_v11, %v1624_v36  ;;  %v2265_v39 = vadd.f32 %v4757_v11, %v2264_v37 }
 0x161   : > { %v3506_v40 = vpop.f32.mrf.mxu0  ;;  %v3698_v41 = vpop.f32.mrf.mxu1 }
 0x162   : > { %2624 = vst.msk [vmem:[%s4247_s27 + $0x230] sm:$0xff] %vm2553_vm1, %v1625_v38  ;;  %2752 = vst.msk [vmem:[%s4247_s27 + $0x630] sm:$0xff] %vm2553_vm1, %v2265_v39  ;;  %v1640_v42 = vadd.f32 %v4757_v11, %v3506_v40  ;;  %v2280_v43 = vadd.f32 %v4757_v11, %v3698_v41 }
 0x163   : > { %v1634_v44 = vpop.f32.mrf.mxu0  ;;  %v2274_v45 = vpop.f32.mrf.mxu1 }
 0x164   : > { %2627 = vst.msk [vmem:[%s4247_s27 + $0x248] sm:$0xff] %vm2553_vm1, %v1640_v42  ;;  %2755 = vst.msk [vmem:[%s4247_s27 + $0x648] sm:$0xff] %vm2553_vm1, %v2280_v43  ;;  %v1635_v46 = vadd.f32 %v4757_v11, %v1634_v44  ;;  %v2275_v47 = vadd.f32 %v4757_v11, %v2274_v45 }
 0x165   : > { %v3509_v48 = vpop.f32.mrf.mxu0  ;;  %v3701_v49 = vpop.f32.mrf.mxu1 }
 0x166   : > { %2626 = vst.msk [vmem:[%s4247_s27 + $0x240] sm:$0xff] %vm2553_vm1, %v1635_v46  ;;  %2754 = vst.msk [vmem:[%s4247_s27 + $0x640] sm:$0xff] %vm2553_vm1, %v2275_v47  ;;  %v1650_v50 = vadd.f32 %v4757_v11, %v3509_v48  ;;  %v2290_v51 = vadd.f32 %v4757_v11, %v3701_v49 }
 0x167   : > { %v1644_v52 = vpop.f32.mrf.mxu0  ;;  %v2284_v53 = vpop.f32.mrf.mxu1 }
 0x168   : > { %2629 = vst.msk [vmem:[%s4247_s27 + $0x258] sm:$0xff] %vm2553_vm1, %v1650_v50  ;;  %2757 = vst.msk [vmem:[%s4247_s27 + $0x658] sm:$0xff] %vm2553_vm1, %v2290_v51  ;;  %v1645_v54 = vadd.f32 %v4757_v11, %v1644_v52  ;;  %v2285_v55 = vadd.f32 %v4757_v11, %v2284_v53 }
 0x169   : > { %v3512_v56 = vpop.f32.mrf.mxu0  ;;  %v3704_v57 = vpop.f32.mrf.mxu1 }
 0x16a   : > { %2628 = vst.msk [vmem:[%s4247_s27 + $0x250] sm:$0xff] %vm2553_vm1, %v1645_v54  ;;  %2756 = vst.msk [vmem:[%s4247_s27 + $0x650] sm:$0xff] %vm2553_vm1, %v2285_v55  ;;  %v1660_v58 = vadd.f32 %v4757_v11, %v3512_v56  ;;  %v2300_v59 = vadd.f32 %v4757_v11, %v3704_v57 }
 0x16b   : > { %v1654_v60 = vpop.f32.mrf.mxu0  ;;  %v2294_v61 = vpop.f32.mrf.mxu1 }
 0x16c   : > { %2631 = vst.msk [vmem:[%s4247_s27 + $0x268] sm:$0xff] %vm2553_vm1, %v1660_v58  ;;  %2759 = vst.msk [vmem:[%s4247_s27 + $0x668] sm:$0xff] %vm2553_vm1, %v2300_v59  ;;  %v1655_v62 = vadd.f32 %v4757_v11, %v1654_v60  ;;  %v2295_v63 = vadd.f32 %v4757_v11, %v2294_v61 }
 0x16d   : > { %v3515_v0 = vpop.f32.mrf.mxu0  ;;  %v3707_v1 = vpop.f32.mrf.mxu1 }
 0x16e   : > { %2630 = vst.msk [vmem:[%s4247_s27 + $0x260] sm:$0xff] %vm2553_vm1, %v1655_v62  ;;  %2758 = vst.msk [vmem:[%s4247_s27 + $0x660] sm:$0xff] %vm2553_vm1, %v2295_v63  ;;  %v1670_v2 = vadd.f32 %v4757_v11, %v3515_v0  ;;  %v2310_v3 = vadd.f32 %v4757_v11, %v3707_v1 }
 0x16f   : > { %v1664_v4 = vpop.f32.mrf.mxu0  ;;  %v2304_v5 = vpop.f32.mrf.mxu1 }
 0x170   : > { %2633 = vst.msk [vmem:[%s4247_s27 + $0x278] sm:$0xff] %vm2553_vm1, %v1670_v2  ;;  %2761 = vst.msk [vmem:[%s4247_s27 + $0x678] sm:$0xff] %vm2553_vm1, %v2310_v3  ;;  %v1665_v7 = vadd.f32 %v4757_v11, %v1664_v4  ;;  %v2305_v8 = vadd.f32 %v4757_v11, %v2304_v5 }
 0x171   : > { %v3518_v9 = vpop.f32.mrf.mxu0  ;;  %v3710_v10 = vpop.f32.mrf.mxu1 }
 0x172   : > { %2632 = vst.msk [vmem:[%s4247_s27 + $0x270] sm:$0xff] %vm2553_vm1, %v1665_v7  ;;  %2760 = vst.msk [vmem:[%s4247_s27 + $0x670] sm:$0xff] %vm2553_vm1, %v2305_v8  ;;  %v1680_v12 = vadd.f32 %v4757_v11, %v3518_v9  ;;  %v2320_v13 = vadd.f32 %v4757_v11, %v3710_v10 }
 0x173   : > { %v1674_v14 = vpop.f32.mrf.mxu0  ;;  %v2314_v15 = vpop.f32.mrf.mxu1 }
 0x174   : > { %2635 = vst.msk [vmem:[%s4247_s27 + $0x288] sm:$0xff] %vm2553_vm1, %v1680_v12  ;;  %2763 = vst.msk [vmem:[%s4247_s27 + $0x688] sm:$0xff] %vm2553_vm1, %v2320_v13  ;;  %v1675_v6 = vadd.f32 %v4757_v11, %v1674_v14  ;;  %v2315_v16 = vadd.f32 %v4757_v11, %v2314_v15 }
 0x175   : > { %v3521_v17 = vpop.f32.mrf.mxu0  ;;  %v3713_v18 = vpop.f32.mrf.mxu1 }
 0x176   : > { %2634 = vst.msk [vmem:[%s4247_s27 + $0x280] sm:$0xff] %vm2553_vm1, %v1675_v6  ;;  %2762 = vst.msk [vmem:[%s4247_s27 + $0x680] sm:$0xff] %vm2553_vm1, %v2315_v16  ;;  %v1690_v19 = vadd.f32 %v4757_v11, %v3521_v17  ;;  %v2330_v20 = vadd.f32 %v4757_v11, %v3713_v18 }
 0x177   : > { %v1684_v21 = vpop.f32.mrf.mxu0  ;;  %v2324_v22 = vpop.f32.mrf.mxu1 }
 0x178   : > { %2637 = vst.msk [vmem:[%s4247_s27 + $0x298] sm:$0xff] %vm2553_vm1, %v1690_v19  ;;  %2765 = vst.msk [vmem:[%s4247_s27 + $0x698] sm:$0xff] %vm2553_vm1, %v2330_v20  ;;  %v1685_v23 = vadd.f32 %v4757_v11, %v1684_v21  ;;  %v2325_v24 = vadd.f32 %v4757_v11, %v2324_v22 }
 0x179   : > { %v3524_v25 = vpop.f32.mrf.mxu0  ;;  %v3716_v26 = vpop.f32.mrf.mxu1 }
 0x17a   : > { %2636 = vst.msk [vmem:[%s4247_s27 + $0x290] sm:$0xff] %vm2553_vm1, %v1685_v23  ;;  %2764 = vst.msk [vmem:[%s4247_s27 + $0x690] sm:$0xff] %vm2553_vm1, %v2325_v24  ;;  %v1700_v27 = vadd.f32 %v4757_v11, %v3524_v25  ;;  %v2340_v28 = vadd.f32 %v4757_v11, %v3716_v26 }
 0x17b   : > { %v1694_v29 = vpop.f32.mrf.mxu0  ;;  %v2334_v30 = vpop.f32.mrf.mxu1 }
 0x17c   : > { %2639 = vst.msk [vmem:[%s4247_s27 + $0x2a8] sm:$0xff] %vm2553_vm1, %v1700_v27  ;;  %2767 = vst.msk [vmem:[%s4247_s27 + $0x6a8] sm:$0xff] %vm2553_vm1, %v2340_v28  ;;  %v1695_v31 = vadd.f32 %v4757_v11, %v1694_v29  ;;  %v2335_v32 = vadd.f32 %v4757_v11, %v2334_v30 }
 0x17d   : > { %v3527_v33 = vpop.f32.mrf.mxu0  ;;  %v3719_v34 = vpop.f32.mrf.mxu1 }
 0x17e   : > { %2638 = vst.msk [vmem:[%s4247_s27 + $0x2a0] sm:$0xff] %vm2553_vm1, %v1695_v31  ;;  %2766 = vst.msk [vmem:[%s4247_s27 + $0x6a0] sm:$0xff] %vm2553_vm1, %v2335_v32  ;;  %v1710_v35 = vadd.f32 %v4757_v11, %v3527_v33  ;;  %v2350_v36 = vadd.f32 %v4757_v11, %v3719_v34 }
 0x17f   : > { %v1704_v37 = vpop.f32.mrf.mxu0  ;;  %v2344_v38 = vpop.f32.mrf.mxu1 }
 0x180   : > { %2641 = vst.msk [vmem:[%s4247_s27 + $0x2b8] sm:$0xff] %vm2553_vm1, %v1710_v35  ;;  %2769 = vst.msk [vmem:[%s4247_s27 + $0x6b8] sm:$0xff] %vm2553_vm1, %v2350_v36  ;;  %v1705_v39 = vadd.f32 %v4757_v11, %v1704_v37  ;;  %v2345_v40 = vadd.f32 %v4757_v11, %v2344_v38 }
 0x181   : > { %v3530_v41 = vpop.f32.mrf.mxu0  ;;  %v3722_v42 = vpop.f32.mrf.mxu1 }
 0x182   : > { %2640 = vst.msk [vmem:[%s4247_s27 + $0x2b0] sm:$0xff] %vm2553_vm1, %v1705_v39  ;;  %2768 = vst.msk [vmem:[%s4247_s27 + $0x6b0] sm:$0xff] %vm2553_vm1, %v2345_v40  ;;  %v1720_v43 = vadd.f32 %v4757_v11, %v3530_v41  ;;  %v2360_v44 = vadd.f32 %v4757_v11, %v3722_v42 }
 0x183   : > { %v1714_v45 = vpop.f32.mrf.mxu0  ;;  %v2354_v46 = vpop.f32.mrf.mxu1 }
 0x184   : > { %2643 = vst.msk [vmem:[%s4247_s27 + $0x2c8] sm:$0xff] %vm2553_vm1, %v1720_v43  ;;  %2771 = vst.msk [vmem:[%s4247_s27 + $0x6c8] sm:$0xff] %vm2553_vm1, %v2360_v44  ;;  %v1715_v47 = vadd.f32 %v4757_v11, %v1714_v45  ;;  %v2355_v48 = vadd.f32 %v4757_v11, %v2354_v46 }
 0x185   : > { %v3533_v49 = vpop.f32.mrf.mxu0  ;;  %v3725_v50 = vpop.f32.mrf.mxu1 }
 0x186   : > { %2642 = vst.msk [vmem:[%s4247_s27 + $0x2c0] sm:$0xff] %vm2553_vm1, %v1715_v47  ;;  %2770 = vst.msk [vmem:[%s4247_s27 + $0x6c0] sm:$0xff] %vm2553_vm1, %v2355_v48  ;;  %v1730_v51 = vadd.f32 %v4757_v11, %v3533_v49  ;;  %v2370_v52 = vadd.f32 %v4757_v11, %v3725_v50 }
 0x187   : > { %v1724_v53 = vpop.f32.mrf.mxu0  ;;  %v2364_v54 = vpop.f32.mrf.mxu1 }
 0x188   : > { %2645 = vst.msk [vmem:[%s4247_s27 + $0x2d8] sm:$0xff] %vm2553_vm1, %v1730_v51  ;;  %2773 = vst.msk [vmem:[%s4247_s27 + $0x6d8] sm:$0xff] %vm2553_vm1, %v2370_v52  ;;  %v1725_v55 = vadd.f32 %v4757_v11, %v1724_v53  ;;  %v2365_v56 = vadd.f32 %v4757_v11, %v2364_v54 }
 0x189   : > { %v3536_v57 = vpop.f32.mrf.mxu0  ;;  %v3728_v58 = vpop.f32.mrf.mxu1 }
 0x18a   : > { %2644 = vst.msk [vmem:[%s4247_s27 + $0x2d0] sm:$0xff] %vm2553_vm1, %v1725_v55  ;;  %2772 = vst.msk [vmem:[%s4247_s27 + $0x6d0] sm:$0xff] %vm2553_vm1, %v2365_v56  ;;  %v1740_v59 = vadd.f32 %v4757_v11, %v3536_v57  ;;  %v2380_v60 = vadd.f32 %v4757_v11, %v3728_v58 }
 0x18b   : > { %v1734_v61 = vpop.f32.mrf.mxu0  ;;  %v2374_v62 = vpop.f32.mrf.mxu1 }
 0x18c   : > { %2647 = vst.msk [vmem:[%s4247_s27 + $0x2e8] sm:$0xff] %vm2553_vm1, %v1740_v59  ;;  %2775 = vst.msk [vmem:[%s4247_s27 + $0x6e8] sm:$0xff] %vm2553_vm1, %v2380_v60  ;;  %v1735_v63 = vadd.f32 %v4757_v11, %v1734_v61  ;;  %v2375_v0 = vadd.f32 %v4757_v11, %v2374_v62 }
 0x18d   : > { %v3539_v1 = vpop.f32.mrf.mxu0  ;;  %v3731_v2 = vpop.f32.mrf.mxu1 }
 0x18e   : > { %2646 = vst.msk [vmem:[%s4247_s27 + $0x2e0] sm:$0xff] %vm2553_vm1, %v1735_v63  ;;  %2774 = vst.msk [vmem:[%s4247_s27 + $0x6e0] sm:$0xff] %vm2553_vm1, %v2375_v0  ;;  %v1750_v3 = vadd.f32 %v4757_v11, %v3539_v1  ;;  %v2390_v4 = vadd.f32 %v4757_v11, %v3731_v2 }
 0x18f   : > { %v1744_v5 = vpop.f32.mrf.mxu0  ;;  %v2384_v7 = vpop.f32.mrf.mxu1 }
 0x190   : > { %2649 = vst.msk [vmem:[%s4247_s27 + $0x2f8] sm:$0xff] %vm2553_vm1, %v1750_v3  ;;  %2777 = vst.msk [vmem:[%s4247_s27 + $0x6f8] sm:$0xff] %vm2553_vm1, %v2390_v4  ;;  %v1745_v8 = vadd.f32 %v4757_v11, %v1744_v5  ;;  %v2385_v9 = vadd.f32 %v4757_v11, %v2384_v7 }
 0x191   : > { %v3542_v10 = vpop.f32.mrf.mxu0  ;;  %v3734_v12 = vpop.f32.mrf.mxu1 }
 0x192   : > { %2648 = vst.msk [vmem:[%s4247_s27 + $0x2f0] sm:$0xff] %vm2553_vm1, %v1745_v8  ;;  %2776 = vst.msk [vmem:[%s4247_s27 + $0x6f0] sm:$0xff] %vm2553_vm1, %v2385_v9  ;;  %v1760_v13 = vadd.f32 %v4757_v11, %v3542_v10  ;;  %v2400_v14 = vadd.f32 %v4757_v11, %v3734_v12 }
 0x193   : > { %v1754_v15 = vpop.f32.mrf.mxu0  ;;  %v2394_v6 = vpop.f32.mrf.mxu1 }
 0x194   : > { %2651 = vst.msk [vmem:[%s4247_s27 + $0x308] sm:$0xff] %vm2553_vm1, %v1760_v13  ;;  %2779 = vst.msk [vmem:[%s4247_s27 + $0x708] sm:$0xff] %vm2553_vm1, %v2400_v14  ;;  %v1755_v16 = vadd.f32 %v4757_v11, %v1754_v15  ;;  %v2395_v17 = vadd.f32 %v4757_v11, %v2394_v6 }
 0x195   : > { %v3545_v18 = vpop.f32.mrf.mxu0  ;;  %v3737_v19 = vpop.f32.mrf.mxu1 }
 0x196   : > { %2650 = vst.msk [vmem:[%s4247_s27 + $0x300] sm:$0xff] %vm2553_vm1, %v1755_v16  ;;  %2778 = vst.msk [vmem:[%s4247_s27 + $0x700] sm:$0xff] %vm2553_vm1, %v2395_v17  ;;  %v1770_v20 = vadd.f32 %v4757_v11, %v3545_v18  ;;  %v2410_v21 = vadd.f32 %v4757_v11, %v3737_v19 }
 0x197   : > { %v1764_v22 = vpop.f32.mrf.mxu0  ;;  %v2404_v23 = vpop.f32.mrf.mxu1 }
 0x198   : > { %2653 = vst.msk [vmem:[%s4247_s27 + $0x318] sm:$0xff] %vm2553_vm1, %v1770_v20  ;;  %2781 = vst.msk [vmem:[%s4247_s27 + $0x718] sm:$0xff] %vm2553_vm1, %v2410_v21  ;;  %v1765_v24 = vadd.f32 %v4757_v11, %v1764_v22  ;;  %v2405_v25 = vadd.f32 %v4757_v11, %v2404_v23 }
 0x199   : > { %v3548_v26 = vpop.f32.mrf.mxu0  ;;  %v3740_v27 = vpop.f32.mrf.mxu1 }
 0x19a   : > { %2652 = vst.msk [vmem:[%s4247_s27 + $0x310] sm:$0xff] %vm2553_vm1, %v1765_v24  ;;  %2780 = vst.msk [vmem:[%s4247_s27 + $0x710] sm:$0xff] %vm2553_vm1, %v2405_v25  ;;  %v1780_v28 = vadd.f32 %v4757_v11, %v3548_v26  ;;  %v2420_v29 = vadd.f32 %v4757_v11, %v3740_v27 }
 0x19b   : > { %v1774_v30 = vpop.f32.mrf.mxu0  ;;  %v2414_v31 = vpop.f32.mrf.mxu1 }
 0x19c   : > { %2655 = vst.msk [vmem:[%s4247_s27 + $0x328] sm:$0xff] %vm2553_vm1, %v1780_v28  ;;  %2783 = vst.msk [vmem:[%s4247_s27 + $0x728] sm:$0xff] %vm2553_vm1, %v2420_v29  ;;  %v1775_v32 = vadd.f32 %v4757_v11, %v1774_v30  ;;  %v2415_v33 = vadd.f32 %v4757_v11, %v2414_v31 }
 0x19d   : > { %v3551_v34 = vpop.f32.mrf.mxu0  ;;  %v3743_v35 = vpop.f32.mrf.mxu1 }
 0x19e   : > { %2654 = vst.msk [vmem:[%s4247_s27 + $0x320] sm:$0xff] %vm2553_vm1, %v1775_v32  ;;  %2782 = vst.msk [vmem:[%s4247_s27 + $0x720] sm:$0xff] %vm2553_vm1, %v2415_v33  ;;  %v1790_v36 = vadd.f32 %v4757_v11, %v3551_v34  ;;  %v2430_v37 = vadd.f32 %v4757_v11, %v3743_v35 }
 0x19f   : > { %v1784_v38 = vpop.f32.mrf.mxu0  ;;  %v2424_v39 = vpop.f32.mrf.mxu1 }
 0x1a0   : > { %2657 = vst.msk [vmem:[%s4247_s27 + $0x338] sm:$0xff] %vm2553_vm1, %v1790_v36  ;;  %2785 = vst.msk [vmem:[%s4247_s27 + $0x738] sm:$0xff] %vm2553_vm1, %v2430_v37  ;;  %v1785_v40 = vadd.f32 %v4757_v11, %v1784_v38  ;;  %v2425_v41 = vadd.f32 %v4757_v11, %v2424_v39 }
 0x1a1   : > { %v3554_v42 = vpop.f32.mrf.mxu0  ;;  %v3746_v43 = vpop.f32.mrf.mxu1 }
 0x1a2   : > { %2656 = vst.msk [vmem:[%s4247_s27 + $0x330] sm:$0xff] %vm2553_vm1, %v1785_v40  ;;  %2784 = vst.msk [vmem:[%s4247_s27 + $0x730] sm:$0xff] %vm2553_vm1, %v2425_v41  ;;  %v1800_v44 = vadd.f32 %v4757_v11, %v3554_v42  ;;  %v2440_v45 = vadd.f32 %v4757_v11, %v3746_v43 }
 0x1a3   : > { %v1794_v46 = vpop.f32.mrf.mxu0  ;;  %v2434_v47 = vpop.f32.mrf.mxu1 }
 0x1a4   : > { %2659 = vst.msk [vmem:[%s4247_s27 + $0x348] sm:$0xff] %vm2553_vm1, %v1800_v44  ;;  %2787 = vst.msk [vmem:[%s4247_s27 + $0x748] sm:$0xff] %vm2553_vm1, %v2440_v45  ;;  %v1795_v48 = vadd.f32 %v4757_v11, %v1794_v46  ;;  %v2435_v49 = vadd.f32 %v4757_v11, %v2434_v47 }
 0x1a5   : > { %v3557_v50 = vpop.f32.mrf.mxu0  ;;  %v3749_v51 = vpop.f32.mrf.mxu1 }
 0x1a6   : > { %2658 = vst.msk [vmem:[%s4247_s27 + $0x340] sm:$0xff] %vm2553_vm1, %v1795_v48  ;;  %2786 = vst.msk [vmem:[%s4247_s27 + $0x740] sm:$0xff] %vm2553_vm1, %v2435_v49  ;;  %v1810_v52 = vadd.f32 %v4757_v11, %v3557_v50  ;;  %v2450_v53 = vadd.f32 %v4757_v11, %v3749_v51 }
 0x1a7   : > { %v1804_v54 = vpop.f32.mrf.mxu0  ;;  %v2444_v55 = vpop.f32.mrf.mxu1 }
 0x1a8   : > { %2661 = vst.msk [vmem:[%s4247_s27 + $0x358] sm:$0xff] %vm2553_vm1, %v1810_v52  ;;  %2789 = vst.msk [vmem:[%s4247_s27 + $0x758] sm:$0xff] %vm2553_vm1, %v2450_v53  ;;  %v1805_v56 = vadd.f32 %v4757_v11, %v1804_v54  ;;  %v2445_v57 = vadd.f32 %v4757_v11, %v2444_v55 }
 0x1a9   : > { %v3560_v58 = vpop.f32.mrf.mxu0  ;;  %v3752_v59 = vpop.f32.mrf.mxu1 }
 0x1aa   : > { %2660 = vst.msk [vmem:[%s4247_s27 + $0x350] sm:$0xff] %vm2553_vm1, %v1805_v56  ;;  %2788 = vst.msk [vmem:[%s4247_s27 + $0x750] sm:$0xff] %vm2553_vm1, %v2445_v57  ;;  %v1820_v60 = vadd.f32 %v4757_v11, %v3560_v58  ;;  %v2460_v61 = vadd.f32 %v4757_v11, %v3752_v59 }
 0x1ab   : > { %v1814_v62 = vpop.f32.mrf.mxu0  ;;  %v2454_v63 = vpop.f32.mrf.mxu1 }
 0x1ac   : > { %2663 = vst.msk [vmem:[%s4247_s27 + $0x368] sm:$0xff] %vm2553_vm1, %v1820_v60  ;;  %2791 = vst.msk [vmem:[%s4247_s27 + $0x768] sm:$0xff] %vm2553_vm1, %v2460_v61  ;;  %v1815_v0 = vadd.f32 %v4757_v11, %v1814_v62  ;;  %v2455_v1 = vadd.f32 %v4757_v11, %v2454_v63 }
 0x1ad   : > { %v3563_v2 = vpop.f32.mrf.mxu0  ;;  %v3755_v3 = vpop.f32.mrf.mxu1 }
 0x1ae   : > { %2662 = vst.msk [vmem:[%s4247_s27 + $0x360] sm:$0xff] %vm2553_vm1, %v1815_v0  ;;  %2790 = vst.msk [vmem:[%s4247_s27 + $0x760] sm:$0xff] %vm2553_vm1, %v2455_v1  ;;  %v1830_v4 = vadd.f32 %v4757_v11, %v3563_v2  ;;  %v2470_v5 = vadd.f32 %v4757_v11, %v3755_v3 }
 0x1af   : > { %v1824_v7 = vpop.f32.mrf.mxu0  ;;  %v2464_v8 = vpop.f32.mrf.mxu1 }
 0x1b0   : > { %2665 = vst.msk [vmem:[%s4247_s27 + $0x378] sm:$0xff] %vm2553_vm1, %v1830_v4  ;;  %2793 = vst.msk [vmem:[%s4247_s27 + $0x778] sm:$0xff] %vm2553_vm1, %v2470_v5  ;;  %v1825_v9 = vadd.f32 %v4757_v11, %v1824_v7  ;;  %v2465_v10 = vadd.f32 %v4757_v11, %v2464_v8 }
 0x1b1   : > { %v3566_v12 = vpop.f32.mrf.mxu0  ;;  %v3758_v13 = vpop.f32.mrf.mxu1 }
 0x1b2   : > { %2664 = vst.msk [vmem:[%s4247_s27 + $0x370] sm:$0xff] %vm2553_vm1, %v1825_v9  ;;  %2792 = vst.msk [vmem:[%s4247_s27 + $0x770] sm:$0xff] %vm2553_vm1, %v2465_v10  ;;  %v1840_v14 = vadd.f32 %v4757_v11, %v3566_v12  ;;  %v2480_v15 = vadd.f32 %v4757_v11, %v3758_v13 }
 0x1b3   : > { %v1834_v6 = vpop.f32.mrf.mxu0  ;;  %v2474_v16 = vpop.f32.mrf.mxu1 }
 0x1b4   : > { %2667 = vst.msk [vmem:[%s4247_s27 + $0x388] sm:$0xff] %vm2553_vm1, %v1840_v14  ;;  %2795 = vst.msk [vmem:[%s4247_s27 + $0x788] sm:$0xff] %vm2553_vm1, %v2480_v15  ;;  %v1835_v17 = vadd.f32 %v4757_v11, %v1834_v6  ;;  %v2475_v18 = vadd.f32 %v4757_v11, %v2474_v16 }
 0x1b5   : > { %v3569_v19 = vpop.f32.mrf.mxu0  ;;  %v3761_v20 = vpop.f32.mrf.mxu1 }
 0x1b6   : > { %2666 = vst.msk [vmem:[%s4247_s27 + $0x380] sm:$0xff] %vm2553_vm1, %v1835_v17  ;;  %2794 = vst.msk [vmem:[%s4247_s27 + $0x780] sm:$0xff] %vm2553_vm1, %v2475_v18  ;;  %v1850_v21 = vadd.f32 %v4757_v11, %v3569_v19  ;;  %v2490_v22 = vadd.f32 %v4757_v11, %v3761_v20 }
 0x1b7   : > { %v1844_v23 = vpop.f32.mrf.mxu0  ;;  %v2484_v24 = vpop.f32.mrf.mxu1 }
 0x1b8   : > { %2669 = vst.msk [vmem:[%s4247_s27 + $0x398] sm:$0xff] %vm2553_vm1, %v1850_v21  ;;  %2797 = vst.msk [vmem:[%s4247_s27 + $0x798] sm:$0xff] %vm2553_vm1, %v2490_v22  ;;  %v1845_v25 = vadd.f32 %v4757_v11, %v1844_v23  ;;  %v2485_v26 = vadd.f32 %v4757_v11, %v2484_v24 }
 0x1b9   : > { %v3572_v27 = vpop.f32.mrf.mxu0  ;;  %v3764_v28 = vpop.f32.mrf.mxu1 }
 0x1ba   : > { %2668 = vst.msk [vmem:[%s4247_s27 + $0x390] sm:$0xff] %vm2553_vm1, %v1845_v25  ;;  %2796 = vst.msk [vmem:[%s4247_s27 + $0x790] sm:$0xff] %vm2553_vm1, %v2485_v26  ;;  %v1860_v29 = vadd.f32 %v4757_v11, %v3572_v27  ;;  %v2500_v30 = vadd.f32 %v4757_v11, %v3764_v28 }
 0x1bb   : > { %v1854_v31 = vpop.f32.mrf.mxu0  ;;  %v2494_v32 = vpop.f32.mrf.mxu1 }
 0x1bc   : > { %2671 = vst.msk [vmem:[%s4247_s27 + $0x3a8] sm:$0xff] %vm2553_vm1, %v1860_v29  ;;  %2799 = vst.msk [vmem:[%s4247_s27 + $0x7a8] sm:$0xff] %vm2553_vm1, %v2500_v30  ;;  %v1855_v33 = vadd.f32 %v4757_v11, %v1854_v31  ;;  %v2495_v34 = vadd.f32 %v4757_v11, %v2494_v32 }
 0x1bd   : > { %v3575_v35 = vpop.f32.mrf.mxu0  ;;  %v3767_v36 = vpop.f32.mrf.mxu1 }
 0x1be   : > { %2670 = vst.msk [vmem:[%s4247_s27 + $0x3a0] sm:$0xff] %vm2553_vm1, %v1855_v33  ;;  %2798 = vst.msk [vmem:[%s4247_s27 + $0x7a0] sm:$0xff] %vm2553_vm1, %v2495_v34  ;;  %v1870_v37 = vadd.f32 %v4757_v11, %v3575_v35  ;;  %v2510_v38 = vadd.f32 %v4757_v11, %v3767_v36 }
 0x1bf   : > { %v1864_v39 = vpop.f32.mrf.mxu0  ;;  %v2504_v40 = vpop.f32.mrf.mxu1 }
 0x1c0   : > { %2673 = vst.msk [vmem:[%s4247_s27 + $0x3b8] sm:$0xff] %vm2553_vm1, %v1870_v37  ;;  %2801 = vst.msk [vmem:[%s4247_s27 + $0x7b8] sm:$0xff] %vm2553_vm1, %v2510_v38  ;;  %v1865_v41 = vadd.f32 %v4757_v11, %v1864_v39  ;;  %v2505_v42 = vadd.f32 %v4757_v11, %v2504_v40 }
 0x1c1   : > { %v3578_v43 = vpop.f32.mrf.mxu0  ;;  %v3770_v44 = vpop.f32.mrf.mxu1 }
 0x1c2   : > { %2672 = vst.msk [vmem:[%s4247_s27 + $0x3b0] sm:$0xff] %vm2553_vm1, %v1865_v41  ;;  %2800 = vst.msk [vmem:[%s4247_s27 + $0x7b0] sm:$0xff] %vm2553_vm1, %v2505_v42  ;;  %v1880_v45 = vadd.f32 %v4757_v11, %v3578_v43  ;;  %v2520_v46 = vadd.f32 %v4757_v11, %v3770_v44 }
 0x1c3   : > { %v1874_v47 = vpop.f32.mrf.mxu0  ;;  %v2514_v48 = vpop.f32.mrf.mxu1 }
 0x1c4   : > { %2675 = vst.msk [vmem:[%s4247_s27 + $0x3c8] sm:$0xff] %vm2553_vm1, %v1880_v45  ;;  %2803 = vst.msk [vmem:[%s4247_s27 + $0x7c8] sm:$0xff] %vm2553_vm1, %v2520_v46  ;;  %v1875_v49 = vadd.f32 %v4757_v11, %v1874_v47  ;;  %v2515_v50 = vadd.f32 %v4757_v11, %v2514_v48 }
 0x1c5   : > { %v3581_v51 = vpop.f32.mrf.mxu0  ;;  %v3773_v52 = vpop.f32.mrf.mxu1 }
 0x1c6   : > { %2674 = vst.msk [vmem:[%s4247_s27 + $0x3c0] sm:$0xff] %vm2553_vm1, %v1875_v49  ;;  %2802 = vst.msk [vmem:[%s4247_s27 + $0x7c0] sm:$0xff] %vm2553_vm1, %v2515_v50  ;;  %v1890_v53 = vadd.f32 %v4757_v11, %v3581_v51  ;;  %v2530_v54 = vadd.f32 %v4757_v11, %v3773_v52 }
 0x1c7   : > { %v1884_v55 = vpop.f32.mrf.mxu0  ;;  %v2524_v56 = vpop.f32.mrf.mxu1 }
 0x1c8   : > { %2677 = vst.msk [vmem:[%s4247_s27 + $0x3d8] sm:$0xff] %vm2553_vm1, %v1890_v53  ;;  %2805 = vst.msk [vmem:[%s4247_s27 + $0x7d8] sm:$0xff] %vm2553_vm1, %v2530_v54  ;;  %v1885_v57 = vadd.f32 %v4757_v11, %v1884_v55  ;;  %v2525_v58 = vadd.f32 %v4757_v11, %v2524_v56 }
 0x1c9   : > { %v3584_v59 = vpop.f32.mrf.mxu0  ;;  %v3776_v60 = vpop.f32.mrf.mxu1 }
 0x1ca   : > { %2676 = vst.msk [vmem:[%s4247_s27 + $0x3d0] sm:$0xff] %vm2553_vm1, %v1885_v57  ;;  %2804 = vst.msk [vmem:[%s4247_s27 + $0x7d0] sm:$0xff] %vm2553_vm1, %v2525_v58  ;;  %v1900_v61 = vadd.f32 %v4757_v11, %v3584_v59  ;;  %v2540_v62 = vadd.f32 %v4757_v11, %v3776_v60 }
 0x1cb   : > { %v1894_v63 = vpop.f32.mrf.mxu0  ;;  %v2534_v0 = vpop.f32.mrf.mxu1 }
 0x1cc   : > { %2679 = vst.msk [vmem:[%s4247_s27 + $0x3e8] sm:$0xff] %vm2553_vm1, %v1900_v61  ;;  %2807 = vst.msk [vmem:[%s4247_s27 + $0x7e8] sm:$0xff] %vm2553_vm1, %v2540_v62  ;;  %v1895_v1 = vadd.f32 %v4757_v11, %v1894_v63  ;;  %v2535_v2 = vadd.f32 %v4757_v11, %v2534_v0 }
 0x1cd   : > { %v3587_v3 = vpop.f32.mrf.mxu0  ;;  %v3779_v4 = vpop.f32.mrf.mxu1 }
 0x1ce   : > { %2678 = vst.msk [vmem:[%s4247_s27 + $0x3e0] sm:$0xff] %vm2553_vm1, %v1895_v1  ;;  %2806 = vst.msk [vmem:[%s4247_s27 + $0x7e0] sm:$0xff] %vm2553_vm1, %v2535_v2  ;;  %v1910_v5 = vadd.f32 %v4757_v11, %v3587_v3  ;;  %v2550_v7 = vadd.f32 %v4757_v11, %v3779_v4 }
 0x1cf   : > { %v1904_v8 = vpop.f32.mrf.mxu0  ;;  %v2544_v9 = vpop.f32.mrf.mxu1 }
 0x1d0   : > { %2681 = vst.msk [vmem:[%s4247_s27 + $0x3f8] sm:$0xff] %vm2553_vm1, %v1910_v5  ;;  %2809 = vst.msk [vmem:[%s4247_s27 + $0x7f8] sm:$0xff] %vm2553_vm1, %v2550_v7  ;;  %v1905_v10 = vadd.f32 %v4757_v11, %v1904_v8  ;;  %v2545_v12 = vadd.f32 %v4757_v11, %v2544_v9 }
 0x1d2   : > { %2680 = vst.msk [vmem:[%s4247_s27 + $0x3f0] sm:$0xff] %vm2553_vm1, %v1905_v10  ;;  %2808 = vst.msk [vmem:[%s4247_s27 + $0x7f0] sm:$0xff] %vm2553_vm1, %v2545_v12 }
 0x1d3 PF: > { %s13_s12 = sadd.s32 1, %s3799_s12  }
 0x1d4   : > { %p10_p4 = scmp.ge.s32.totalorder %s13_s12, 4  }
 0x1d6   :  { %12 = sbr.rel (!%p10_p4) target bundleno = 1 (0x1), region = 62 }

</bundles_post_ra>
